<compile_context>
chip_gen: v7x
topology: tpu7x:2x2x1
jax: 0.10.0
libtpu: 0.0.40
codegen_flags: <defaults>
</compile_context>

<pallas_src>
import jax
import jax.numpy as jnp
from jax.experimental import pallas as pl
from jax.experimental.pallas import tpu as pltpu

HALF_LOG_2PI = 0.9189385332046727  # 0.5 * log(2*pi)
LANES = 128                        # lane-dense output slab width
H_SIZE = 256


def _round_up(n, m):
    return ((n + m - 1) // m) * m


def policy_act_kernel(
    x_ref,                              # (TILE_B, S)  f32
    w1a_ref,                            # (S, H + 128) bf16: [:, :H] = w1, [:, H:H+A] = actor
    b1_ref,                             # (1, H) f32
    w2_ref, b2_ref, w3_ref, b3_ref,     # critic layers 2-3 (bf16 weights, f32 biases)
    w4_ref, b4_ref,                     # critic layer 4
    w5_pad_ref,                         # (H, 128) bf16: col A = critic head weight, rest 0
    bpad_ref,                           # (1, 128) f32:  [ba..., b5, logp_const, 0...]
    out_ref,                            # (TILE_B, 128) f32 packed slab
):
    H = b1_ref.shape[1]
    xb = x_ref[...].astype(jnp.bfloat16)

    # ---- fused first matmul: critic layer 1 + actor mean in one MXU pass ----
    h1a = jnp.dot(xb, w1a_ref[...], preferred_element_type=jnp.float32)
    h = jnp.maximum(h1a[:, :H] + b1_ref[...], 0.0)   # critic layer 1 (+ReLU)
    act = h1a[:, H:]                                 # actor lanes (128-aligned slice)

    # ---- critic trunk layers 2-4: bf16 matmul / f32 accumulate + bias + ReLU ----
    h = jnp.maximum(
        jnp.dot(h.astype(jnp.bfloat16), w2_ref[...],
                preferred_element_type=jnp.float32) + b2_ref[...], 0.0)
    h = jnp.maximum(
        jnp.dot(h.astype(jnp.bfloat16), w3_ref[...],
                preferred_element_type=jnp.float32) + b3_ref[...], 0.0)
    h = jnp.maximum(
        jnp.dot(h.astype(jnp.bfloat16), w4_ref[...],
                preferred_element_type=jnp.float32) + b4_ref[...], 0.0)

    # ---- fused lane-dense epilogue: action lanes + value lane + logp lane ----
    # action (deterministic => dist.mode() == mean) lands in lanes [0, A),
    # value in lane A, and the closed-form log-prob constant rides in the bias slab.
    out_ref[...] = (
        act
        + jnp.dot(h.astype(jnp.bfloat16), w5_pad_ref[...],
                  preferred_element_type=jnp.float32)
        + bpad_ref[...])

    # TODO(synk): stochastic sampling (deterministic=False) would need pltpu.prng_* draws.


def init_params(key, state_dim, action_dim, h_size=H_SIZE):
    """Synthetic init mirroring init_r_ (orthogonal w/ relu gain, zero bias)."""
    gain = float(jnp.sqrt(2.0))  # nn.init.calculate_gain('relu')
    ortho = jax.nn.initializers.orthogonal(scale=gain)
    ks = jax.random.split(key, 6)
    return {
        # actor / controller: modeled as one Linear state_dim -> action_dim
        # TODO(synk): the real `controller` module is external; modeled as a single Linear.
        "wa": ortho(ks[0], (state_dim, action_dim), jnp.float32),
        "ba": jnp.zeros((1, action_dim), jnp.float32),
        # critic MLP
        "w1": ortho(ks[1], (state_dim, h_size), jnp.float32),
        "b1": jnp.zeros((1, h_size), jnp.float32),
        "w2": ortho(ks[2], (h_size, h_size), jnp.float32),
        "b2": jnp.zeros((1, h_size), jnp.float32),
        "w3": ortho(ks[3], (h_size, h_size), jnp.float32),
        "b3": jnp.zeros((1, h_size), jnp.float32),
        "w4": ortho(ks[4], (h_size, h_size), jnp.float32),
        "b4": jnp.zeros((1, h_size), jnp.float32),
        "w5": ortho(ks[5], (h_size, 1), jnp.float32),
        "b5": jnp.zeros((1, 1), jnp.float32),
        # DiagGaussian logstd bias parameter (zeros in __init__)
        "logstd_bias": jnp.zeros((1, action_dim), jnp.float32),
    }


def pack_params(params):
    """One-time (outside jit) repack: bf16 weights + lane-padded / fused actor weights."""
    bf = jnp.bfloat16
    S, A = params["wa"].shape
    H = params["w1"].shape[1]
    assert A + 2 <= LANES, "action_dim + 2 must fit in one 128-lane slab"

    wa_pad = jnp.zeros((S, LANES), jnp.float32).at[:, :A].set(params["wa"])
    w1a = jnp.concatenate([params["w1"], wa_pad], axis=1).astype(bf)   # (S, H+128)
    w5_pad = jnp.zeros((H, LANES), jnp.float32).at[:, A:A + 1].set(params["w5"]).astype(bf)

    b_base = jnp.zeros((1, LANES), jnp.float32)
    b_base = b_base.at[0, :A].set(params["ba"][0])
    b_base = b_base.at[0, A].set(params["b5"][0, 0])
    logp_lane = jnp.zeros((1, LANES), jnp.float32).at[0, A + 1].set(1.0)

    return {
        "w1a": w1a, "b1": params["b1"],
        "w2": params["w2"].astype(bf), "b2": params["b2"],
        "w3": params["w3"].astype(bf), "b3": params["b3"],
        "w4": params["w4"].astype(bf), "b4": params["b4"],
        "w5_pad": w5_pad,
        "b_base": b_base, "logp_lane": logp_lane,
        "logstd_bias": params["logstd_bias"],
    }


@jax.jit
def policy_act(x, packed):
    B, S = x.shape
    A = packed["logstd_bias"].shape[1]
    H = packed["b1"].shape[1]

    # DiagGaussian branch + closed-form deterministic log-prob:
    #   action == mean  =>  log_probs = -(sum(logstd) + A * 0.5*log(2*pi))
    lb = packed["logstd_bias"]
    logstd_eff = jnp.where(jnp.mean(lb) >= -2.5, lb, jnp.full_like(lb, -2.5))
    logp_const = -(jnp.sum(logstd_eff) + A * HALF_LOG_2PI)
    b_pad = packed["b_base"] + logp_const * packed["logp_lane"]

    # Batch tiling (cap sized conservatively so it also fits v7x's smaller VMEM).
    tile_b = min(128, _round_up(B, 8))
    bp = _round_up(B, tile_b)
    xp = x if bp == B else jnp.pad(x, ((0, bp - B), (0, 0)))
    grid = (bp // tile_b,)

    def w_spec(shape):
        return pl.BlockSpec(shape, lambda i: (0, 0))  # weight stays VMEM-resident

    flops = 2 * bp * (S * (H + LANES) + 3 * H * H + H * LANES)
    bytes_accessed = (
        xp.size * 4
        + sum(int(packed[k].size) * packed[k].dtype.itemsize
              for k in ("w1a", "b1", "w2", "b2", "w3", "b3", "w4", "b4", "w5_pad"))
        + LANES * 4            # bias slab
        + bp * LANES * 4)      # output slab

    slab = pl.pallas_call(
        policy_act_kernel,
        out_shape=jax.ShapeDtypeStruct((bp, LANES), jnp.float32),
        grid=grid,
        in_specs=[
            pl.BlockSpec((tile_b, S), lambda i: (i, 0)),
            w_spec(packed["w1a"].shape), w_spec(packed["b1"].shape),
            w_spec(packed["w2"].shape), w_spec(packed["b2"].shape),
            w_spec(packed["w3"].shape), w_spec(packed["b3"].shape),
            w_spec(packed["w4"].shape), w_spec(packed["b4"].shape),
            w_spec(packed["w5_pad"].shape),
            w_spec(b_pad.shape),
        ],
        out_specs=pl.BlockSpec((tile_b, LANES), lambda i: (i, 0)),
        compiler_params=pltpu.CompilerParams(dimension_semantics=("parallel",)),
        cost_estimate=pl.CostEstimate(
            flops=flops, transcendentals=0, bytes_accessed=bytes_accessed),
    )(xp,
      packed["w1a"], packed["b1"], packed["w2"], packed["b2"],
      packed["w3"], packed["b3"], packed["w4"], packed["b4"],
      packed["w5_pad"], b_pad)

    action = slab[:B, :A]
    value = slab[:B, A:A + 1]
    logp = slab[:B, A + 1:A + 2]
    return value, action, logp


def policy_act_ref(x, params):
    """Pure-JAX reference (same bf16 weight quantization / f32 accumulation)."""
    bf, f32 = jnp.bfloat16, jnp.float32

    def dot(a, w):
        return jnp.dot(a.astype(bf), w.astype(bf), preferred_element_type=f32)

    h = jnp.maximum(dot(x, params["w1"]) + params["b1"], 0.0)
    h = jnp.maximum(dot(h, params["w2"]) + params["b2"], 0.0)
    h = jnp.maximum(dot(h, params["w3"]) + params["b3"], 0.0)
    h = jnp.maximum(dot(h, params["w4"]) + params["b4"], 0.0)
    value = dot(h, params["w5"]) + params["b5"]

    mean = dot(x, params["wa"]) + params["ba"]

    lb = params["logstd_bias"]
    logstd = jnp.where(jnp.mean(lb) >= -2.5, lb, jnp.full_like(lb, -2.5))
    std = jnp.exp(logstd)
    lp = -((mean - mean) ** 2) / (2.0 * std ** 2) - logstd - HALF_LOG_2PI
    return value, mean, jnp.sum(lp, axis=-1, keepdims=True)


if __name__ == "__main__":
    key = jax.random.PRNGKey(0)
    k_param, k_x = jax.random.split(key)

    batch, state_dim, action_dim = 200, 32, 8   # exercises grid=(2,) + row padding
    params = init_params(k_param, state_dim, action_dim, h_size=H_SIZE)
    packed = pack_params(params)
    x = jax.random.normal(k_x, (batch, state_dim), jnp.float32)

    value, action, logp = policy_act(x, packed)
    jax.block_until_ready((value, action, logp))

    v_ref, a_ref, lp_ref = policy_act_ref(x, params)
    assert value.shape == (batch, 1)
    assert action.shape == (batch, action_dim)
    assert logp.shape == (batch, 1)
    assert jnp.allclose(value, v_ref, atol=1e-3, rtol=1e-3)
    assert jnp.allclose(action, a_ref, atol=1e-3, rtol=1e-3)
    assert jnp.allclose(logp, lp_ref, atol=1e-3, rtol=1e-3)

    print("KERNEL_OK")
</pallas_src>

<mosaic_0001>
module attributes {stable_mosaic.version = 11 : i64} {
  func.func @policy_act_kernel(%arg0: i32, %arg1: memref<128x32xf32, #tpu.memory_space<vmem>>, %arg2: memref<32x384xbf16, #tpu.memory_space<vmem>>, %arg3: memref<1x256xf32, #tpu.memory_space<vmem>>, %arg4: memref<256x256xbf16, #tpu.memory_space<vmem>>, %arg5: memref<1x256xf32, #tpu.memory_space<vmem>>, %arg6: memref<256x256xbf16, #tpu.memory_space<vmem>>, %arg7: memref<1x256xf32, #tpu.memory_space<vmem>>, %arg8: memref<256x256xbf16, #tpu.memory_space<vmem>>, %arg9: memref<1x256xf32, #tpu.memory_space<vmem>>, %arg10: memref<256x128xbf16, #tpu.memory_space<vmem>>, %arg11: memref<1x128xf32, #tpu.memory_space<vmem>>, %arg12: memref<128x128xf32, #tpu.memory_space<vmem>>) attributes {dimension_semantics = [#tpu.dimension_semantics<parallel>], iteration_bounds = array<i64: 2>, scalar_prefetch = 0 : i64, scratch_operands = 0 : i64, tpu.core_type = #tpu.core_type<tc>, window_params = [{transform_indices = @transform_0, window_bounds = array<i64: 128, 32>}, {pipeline_mode = #tpu.pipeline_mode<synchronous>, transform_indices = @transform_1, window_bounds = array<i64: 32, 384>}, {pipeline_mode = #tpu.pipeline_mode<synchronous>, transform_indices = @transform_2, window_bounds = array<i64: 1, 256>}, {pipeline_mode = #tpu.pipeline_mode<synchronous>, transform_indices = @transform_3, window_bounds = array<i64: 256, 256>}, {pipeline_mode = #tpu.pipeline_mode<synchronous>, transform_indices = @transform_4, window_bounds = array<i64: 1, 256>}, {pipeline_mode = #tpu.pipeline_mode<synchronous>, transform_indices = @transform_5, window_bounds = array<i64: 256, 256>}, {pipeline_mode = #tpu.pipeline_mode<synchronous>, transform_indices = @transform_6, window_bounds = array<i64: 1, 256>}, {pipeline_mode = #tpu.pipeline_mode<synchronous>, transform_indices = @transform_7, window_bounds = array<i64: 256, 256>}, {pipeline_mode = #tpu.pipeline_mode<synchronous>, transform_indices = @transform_8, window_bounds = array<i64: 1, 256>}, {pipeline_mode = #tpu.pipeline_mode<synchronous>, transform_indices = @transform_9, window_bounds = array<i64: 256, 128>}, {pipeline_mode = #tpu.pipeline_mode<synchronous>, transform_indices = @transform_10, window_bounds = array<i64: 1, 128>}, {transform_indices = @transform_11, window_bounds = array<i64: 128, 128>}]} {
    %c0 = arith.constant 0 : index
    %c0_0 = arith.constant 0 : index
    %0 = vector.load %arg1[%c0, %c0_0] : memref<128x32xf32, #tpu.memory_space<vmem>>, vector<128x32xf32>
    %1 = arith.truncf %0 : vector<128x32xf32> to vector<128x32xbf16>
    %c0_1 = arith.constant 0 : index
    %c0_2 = arith.constant 0 : index
    %2 = vector.load %arg2[%c0_1, %c0_2] : memref<32x384xbf16, #tpu.memory_space<vmem>>, vector<32x384xbf16>
    %cst = arith.constant dense<0.000000e+00> : vector<128x384xf32>
    %3 = tpu.matmul %1, %2, %cst {dimension_numbers = #tpu.dot_dimension_numbers<[1], [0], [0], [1], [0, 0, 1, 1], [], []>} : vector<128x32xbf16>, vector<32x384xbf16>, vector<128x384xf32> -> vector<128x384xf32>
    %4 = vector.extract_strided_slice %3 {offsets = [0, 0], sizes = [128, 256], strides = [1, 1]} : vector<128x384xf32> to vector<128x256xf32>
    %c0_3 = arith.constant 0 : index
    %c0_4 = arith.constant 0 : index
    %5 = vector.load %arg3[%c0_3, %c0_4] : memref<1x256xf32, #tpu.memory_space<vmem>>, vector<1x256xf32>
    %6 = vector.broadcast %5 : vector<1x256xf32> to vector<128x256xf32>
    %7 = arith.addf %4, %6 : vector<128x256xf32>
    %cst_5 = arith.constant 0.000000e+00 : f32
    %8 = vector.broadcast %cst_5 : f32 to vector<128x256xf32>
    %9 = arith.maximumf %7, %8 : vector<128x256xf32>
    %10 = vector.extract_strided_slice %3 {offsets = [0, 256], sizes = [128, 128], strides = [1, 1]} : vector<128x384xf32> to vector<128x128xf32>
    %11 = arith.truncf %9 : vector<128x256xf32> to vector<128x256xbf16>
    %c0_6 = arith.constant 0 : index
    %c0_7 = arith.constant 0 : index
    %12 = vector.load %arg4[%c0_6, %c0_7] : memref<256x256xbf16, #tpu.memory_space<vmem>>, vector<256x256xbf16>
    %cst_8 = arith.constant dense<0.000000e+00> : vector<128x256xf32>
    %13 = tpu.matmul %11, %12, %cst_8 {dimension_numbers = #tpu.dot_dimension_numbers<[1], [0], [0], [1], [0, 0, 1, 1], [], []>} : vector<128x256xbf16>, vector<256x256xbf16>, vector<128x256xf32> -> vector<128x256xf32>
    %c0_9 = arith.constant 0 : index
    %c0_10 = arith.constant 0 : index
    %14 = vector.load %arg5[%c0_9, %c0_10] : memref<1x256xf32, #tpu.memory_space<vmem>>, vector<1x256xf32>
    %15 = vector.broadcast %14 : vector<1x256xf32> to vector<128x256xf32>
    %16 = arith.addf %13, %15 : vector<128x256xf32>
    %cst_11 = arith.constant 0.000000e+00 : f32
    %17 = vector.broadcast %cst_11 : f32 to vector<128x256xf32>
    %18 = arith.maximumf %16, %17 : vector<128x256xf32>
    %19 = arith.truncf %18 : vector<128x256xf32> to vector<128x256xbf16>
    %c0_12 = arith.constant 0 : index
    %c0_13 = arith.constant 0 : index
    %20 = vector.load %arg6[%c0_12, %c0_13] : memref<256x256xbf16, #tpu.memory_space<vmem>>, vector<256x256xbf16>
    %cst_14 = arith.constant dense<0.000000e+00> : vector<128x256xf32>
    %21 = tpu.matmul %19, %20, %cst_14 {dimension_numbers = #tpu.dot_dimension_numbers<[1], [0], [0], [1], [0, 0, 1, 1], [], []>} : vector<128x256xbf16>, vector<256x256xbf16>, vector<128x256xf32> -> vector<128x256xf32>
    %c0_15 = arith.constant 0 : index
    %c0_16 = arith.constant 0 : index
    %22 = vector.load %arg7[%c0_15, %c0_16] : memref<1x256xf32, #tpu.memory_space<vmem>>, vector<1x256xf32>
    %23 = vector.broadcast %22 : vector<1x256xf32> to vector<128x256xf32>
    %24 = arith.addf %21, %23 : vector<128x256xf32>
    %cst_17 = arith.constant 0.000000e+00 : f32
    %25 = vector.broadcast %cst_17 : f32 to vector<128x256xf32>
    %26 = arith.maximumf %24, %25 : vector<128x256xf32>
    %27 = arith.truncf %26 : vector<128x256xf32> to vector<128x256xbf16>
    %c0_18 = arith.constant 0 : index
    %c0_19 = arith.constant 0 : index
    %28 = vector.load %arg8[%c0_18, %c0_19] : memref<256x256xbf16, #tpu.memory_space<vmem>>, vector<256x256xbf16>
    %cst_20 = arith.constant dense<0.000000e+00> : vector<128x256xf32>
    %29 = tpu.matmul %27, %28, %cst_20 {dimension_numbers = #tpu.dot_dimension_numbers<[1], [0], [0], [1], [0, 0, 1, 1], [], []>} : vector<128x256xbf16>, vector<256x256xbf16>, vector<128x256xf32> -> vector<128x256xf32>
    %c0_21 = arith.constant 0 : index
    %c0_22 = arith.constant 0 : index
    %30 = vector.load %arg9[%c0_21, %c0_22] : memref<1x256xf32, #tpu.memory_space<vmem>>, vector<1x256xf32>
    %31 = vector.broadcast %30 : vector<1x256xf32> to vector<128x256xf32>
    %32 = arith.addf %29, %31 : vector<128x256xf32>
    %cst_23 = arith.constant 0.000000e+00 : f32
    %33 = vector.broadcast %cst_23 : f32 to vector<128x256xf32>
    %34 = arith.maximumf %32, %33 : vector<128x256xf32>
    %35 = arith.truncf %34 : vector<128x256xf32> to vector<128x256xbf16>
    %c0_24 = arith.constant 0 : index
    %c0_25 = arith.constant 0 : index
    %36 = vector.load %arg10[%c0_24, %c0_25] : memref<256x128xbf16, #tpu.memory_space<vmem>>, vector<256x128xbf16>
    %cst_26 = arith.constant dense<0.000000e+00> : vector<128x128xf32>
    %37 = tpu.matmul %35, %36, %cst_26 {dimension_numbers = #tpu.dot_dimension_numbers<[1], [0], [0], [1], [0, 0, 1, 1], [], []>} : vector<128x256xbf16>, vector<256x128xbf16>, vector<128x128xf32> -> vector<128x128xf32>
    %38 = arith.addf %10, %37 : vector<128x128xf32>
    %c0_27 = arith.constant 0 : index
    %c0_28 = arith.constant 0 : index
    %39 = vector.load %arg11[%c0_27, %c0_28] : memref<1x128xf32, #tpu.memory_space<vmem>>, vector<1x128xf32>
    %40 = vector.broadcast %39 : vector<1x128xf32> to vector<128x128xf32>
    %41 = arith.addf %38, %40 : vector<128x128xf32>
    %c0_29 = arith.constant 0 : index
    %c0_30 = arith.constant 0 : index
    %42 = vector.load %arg12[%c0_29, %c0_30] : memref<128x128xf32, #tpu.memory_space<vmem>>, vector<128x128xf32>
    tpu.vector_store %arg12[%c0_29, %c0_30], %41 {strides = array<i32>} : memref<128x128xf32, #tpu.memory_space<vmem>>, vector<128x128xf32>,
    return
  }
  func.func @transform_0(%arg0: i32) -> (i32, i32) {
    %c0_i32 = arith.constant 0 : i32
    %c0_i32_0 = arith.constant 0 : i32
    return %arg0, %c0_i32 : i32, i32
  }
  func.func @transform_1(%arg0: i32) -> (i32, i32) {
    %c0_i32 = arith.constant 0 : i32
    %c0_i32_0 = arith.constant 0 : i32
    %c0_i32_1 = arith.constant 0 : i32
    return %c0_i32, %c0_i32_0 : i32, i32
  }
  func.func @transform_2(%arg0: i32) -> (i32, i32) {
    %c0_i32 = arith.constant 0 : i32
    %c0_i32_0 = arith.constant 0 : i32
    %c0_i32_1 = arith.constant 0 : i32
    return %c0_i32, %c0_i32_0 : i32, i32
  }
  func.func @transform_3(%arg0: i32) -> (i32, i32) {
    %c0_i32 = arith.constant 0 : i32
    %c0_i32_0 = arith.constant 0 : i32
    %c0_i32_1 = arith.constant 0 : i32
    return %c0_i32, %c0_i32_0 : i32, i32
  }
  func.func @transform_4(%arg0: i32) -> (i32, i32) {
    %c0_i32 = arith.constant 0 : i32
    %c0_i32_0 = arith.constant 0 : i32
    %c0_i32_1 = arith.constant 0 : i32
    return %c0_i32, %c0_i32_0 : i32, i32
  }
  func.func @transform_5(%arg0: i32) -> (i32, i32) {
    %c0_i32 = arith.constant 0 : i32
    %c0_i32_0 = arith.constant 0 : i32
    %c0_i32_1 = arith.constant 0 : i32
    return %c0_i32, %c0_i32_0 : i32, i32
  }
  func.func @transform_6(%arg0: i32) -> (i32, i32) {
    %c0_i32 = arith.constant 0 : i32
    %c0_i32_0 = arith.constant 0 : i32
    %c0_i32_1 = arith.constant 0 : i32
    return %c0_i32, %c0_i32_0 : i32, i32
  }
  func.func @transform_7(%arg0: i32) -> (i32, i32) {
    %c0_i32 = arith.constant 0 : i32
    %c0_i32_0 = arith.constant 0 : i32
    %c0_i32_1 = arith.constant 0 : i32
    return %c0_i32, %c0_i32_0 : i32, i32
  }
  func.func @transform_8(%arg0: i32) -> (i32, i32) {
    %c0_i32 = arith.constant 0 : i32
    %c0_i32_0 = arith.constant 0 : i32
    %c0_i32_1 = arith.constant 0 : i32
    return %c0_i32, %c0_i32_0 : i32, i32
  }
  func.func @transform_9(%arg0: i32) -> (i32, i32) {
    %c0_i32 = arith.constant 0 : i32
    %c0_i32_0 = arith.constant 0 : i32
    %c0_i32_1 = arith.constant 0 : i32
    return %c0_i32, %c0_i32_0 : i32, i32
  }
  func.func @transform_10(%arg0: i32) -> (i32, i32) {
    %c0_i32 = arith.constant 0 : i32
    %c0_i32_0 = arith.constant 0 : i32
    %c0_i32_1 = arith.constant 0 : i32
    return %c0_i32, %c0_i32_0 : i32, i32
  }
  func.func @transform_11(%arg0: i32) -> (i32, i32) {
    %c0_i32 = arith.constant 0 : i32
    %c0_i32_0 = arith.constant 0 : i32
    return %arg0, %c0_i32 : i32, i32
  }
}

</mosaic_0001>

<bundles_post_ra>
// kernel: policy_act.1
= control target key start
LH: loop header
LB: loop body
LE: loop exit
PB: predicated region body
PF: predicated region fallthrough
CT: control target
= control target key end

     0   :  { %16 = vsyncpa [#allocation3], 0  ;;  %s2776_s17 = smov 0   ;;  %s3417_s0 = inlined_call_operand.vmem [shape: f32[256,32], index: 0, kind: input, shape index: {}]   ;;  %s3418_s1 = inlined_call_operand.vmem [shape: bf16[32,384], index: 1, kind: input, shape index: {}]   ;;  %s3419_s2 = inlined_call_operand.vmem [shape: f32[1,256], index: 2, kind: input, shape index: {}]   ;;  %s3420_s3 = inlined_call_operand.vmem [shape: bf16[256,256], index: 3, kind: input, shape index: {}]   ;;  %s3421_s4 = inlined_call_operand.vmem [shape: f32[1,256], index: 4, kind: input, shape index: {}]   ;;  %s3422_s5 = inlined_call_operand.vmem [shape: bf16[256,256], index: 5, kind: input, shape index: {}]   ;;  %s3423_s6 = inlined_call_operand.vmem [shape: f32[1,256], index: 6, kind: input, shape index: {}]   ;;  %s3424_s7 = inlined_call_operand.hbm [shape: bf16[256,256], index: 7, kind: input, shape index: {}]   ;;  %s3425_s8 = inlined_call_operand.vmem [shape: f32[1,256], index: 8, kind: input, shape index: {}]   ;;  %s3426_s9 = inlined_call_operand.vmem [shape: bf16[256,128], index: 9, kind: input, shape index: {}]   ;;  %s3427_s10 = inlined_call_operand.vmem [shape: f32[1,128], index: 10, kind: input, shape index: {}]   ;;  %s3428_s11 = inlined_call_operand.vmem [shape: f32[256,128], index: 11, kind: output, shape index: {}]  }
   0x1 LB: > { %s2240_s18 = sadd.s32 4294967295, %s2710_s17   ;;  %p2242_p0 = scmp.ge.s32.totalorder %s2710_s17, 1  ;;  %s2710_s17 = sphi %s2776_s17, %s22_s17  }
   0x2   : > { %p289_p1 = scmp.lt.s32.totalorder %s2710_s17, 3  ;;  %s2712_s19 = smov [#allocation2]  }
   0x3   : > { %s319_s20 = sshll.u32 %s2712_s19, 4  ;;  %p2790_p3 = scmp.eq.s32.totalorder %s2240_s18, 0  ;;  %s320_s20 = int_to_ptr.vmem [resolvable:$true] %s319_s20 }
   0x4   : > { %p2784_p2 = pnand %p2242_p0, %p289_p1  ;;  %s2672_s26 = scalar_lea.hbm %s3424_s7, 4096 }
   0x5   : > { %s3433_s22 = scalar_select %p2790_p3, 1, 0 }
   0x6   : > { %s3432_s21 = scalar_select %p2784_p2, 1, 0 }
   0x7   : > { %p2486_p4 = pneg %p2784_p2  ;;  %p2673_p6 = scmp.ne.s32.totalorder %s3424_s7, %s2672_s26 }
   0x8   : > { %p2679_p10 = scmp.lt.u32.totalorder %s2672_s26, %s3424_s7 }
   0x9   : > { %p2798_p5 = pnand %p2790_p3, %p2486_p4 }
   0xb   : > { %p2674_p7 = pneg %p2798_p5 }
   0xd   : > { %p2675_p8 = pnand %p2674_p7, %p2673_p6 }
   0xf   : > { %p2676_p9 = pneg %p2675_p8 }
  0x11   : > { %p2681_p11 = pnand %p2679_p10, %p2676_p9 }
  0x13   : > { %2684 = shalt.err (!%p2681_p11)
}
  0x14   : > { %s2685_s12 = scalar_lea.vmem %s320_s20, 4096  ;;  %p2693_p1 = scmp.lt.s32.totalorder %s320_s20, %s320_s20 }
  0x15   : > { %p2686_p12 = scmp.ne.s32.totalorder %s320_s20, %s2685_s12  ;;  %p2694_p4 = scmp.lt.s32.totalorder %s2685_s12, %s2685_s12 }
  0x17   : > { %p2688_p13 = pnand %p2686_p12, %p2674_p7  ;;  %p2695_p3 = por %p2694_p4, %p2693_p1 }
  0x19   : > { %p2689_p0 = pneg %p2688_p13 }
  0x1b   : > { %p2696_p2 = pnand %p2695_p3, %p2689_p0 }
  0x1d   : > { %2699 = shalt.err (!%p2696_p2)
}
  0x1e   : > { %s2713_s13 = smov 128   ;;  %s2714_s14 = smov 8  }
  0x1f   : > { %2489 = dma.hbm_to_vmem [thread:$0]  (!%p2798_p5), %s3424_s7, 4096, %s320_s20, [#allocation3], %s2713_s13, %s2713_s13, %s2714_s14  }
  0x20   : > { %p3435_p6 = scmp.ne.s32.totalorder %s3432_s21, 0 }
  0x21   : > { %p3436_p8 = scmp.ne.s32.totalorder (!%p3435_p6), %s3433_s22, 0 }
  0x22   : > { %353 = sbr.rel (%p3435_p6) target bundleno = 1217 (0x4c1), region = 64 }
  0x29   : > { %2705 = dma.done.wait (%p3436_p8), [#allocation3], 4096  }
  0x2a   : > { %2707 = vsyncadd (%p3436_p8), [#allocation3], 4294963200  ;;  %s2247_s19 = sshll.u32 %s2240_s18, 4  ;;  %v2715_v0 = vmov 0   ;;  %v2504_v1 = vld [vmem:[%s3418_s1 + $0x4] ss:$12 sps:$4 sm:$0xff]  }
  0x2b   : > { %527 = vmatprep.mubr.bf16.mxu0 %v2715_v0  ;;  %p394_p2 = scmp.lt.s32.totalorder %s2247_s19, 31  ;;  %v2506_v2 = vld [vmem:[%s3418_s1] ss:$12 sps:$4 sm:$0xff]   ;;  %495 = vmatprep.subr.bf16.mxu0 %v2504_v1  ;;  %v2507_v3 = vld [vmem:[%s3418_s1 + $0x1c] ss:$12 sps:$4 sm:$0xff]   ;;  %vm470_vm0 = vcmask 261120  }
  0x2c   : > { %496 = vmatpush1.bf16.msra.mxu0 %v2506_v2  ;;  %v2509_v5 = vld [vmem:[%s3418_s1 + $0x18] ss:$12 sps:$4 sm:$0xff]   ;;  %v2510_v8 = vld [vmem:[%s3420_s3] ss:$8 sps:$4 sm:$0xff]   ;;  %v2515_v10 = vld [vmem:[%s3420_s3 + $0x14] ss:$8 sps:$4 sm:$0xff]  }
  0x2d   : > { %s3438_s19 = smov (!%p394_p2, %s2247_s19), 31  ;;  %497 = vmatprep.subr.bf16.mxu0 %v2507_v3  ;;  %v2512_v9 = vld [vmem:[%s3420_s3 + $0x4] ss:$8 sps:$4 sm:$0xff]   ;;  %v2513_v13 = vld [vmem:[%s3420_s3 + $0x10] ss:$8 sps:$4 sm:$0xff]  }
  0x2e   : > { %s2248_s20 = sshll.u32 %s3438_s19, 3  ;;  %v2518_v14 = vld [vmem:[%s3420_s3 + $0x24] ss:$8 sps:$4 sm:$0xff]   ;;  %v2516_v16 = vld [vmem:[%s3420_s3 + $0x20] ss:$8 sps:$4 sm:$0xff]  }
  0x2f   : > { %s2835_s24 = scalar_lea.vmem %s3417_s0, %s2248_s20  ;;  %v2521_v17 = vld [vmem:[%s3420_s3 + $0x34] ss:$8 sps:$4 sm:$0xff]   ;;  %v2519_v20 = vld [vmem:[%s3420_s3 + $0x30] ss:$8 sps:$4 sm:$0xff]   ;;  %v2524_v21 = vld [vmem:[%s3420_s3 + $0x44] ss:$8 sps:$4 sm:$0xff]   ;;  %s3365_s15 = scalar_lea.vmem %s3428_s11, %s2248_s20 }
  0x30   : > { %v406_v4 = vld [vmem:[%s2835_s24] sm:$0xff]  ;;  %v407_v6 = vld [vmem:[%s2835_s24 + $0x8] sm:$0xff]  ;;  %498 = vmatpush1.bf16.msra.mxu0 %v2509_v5  ;;  %v408_v11 = vld [vmem:[%s2835_s24 + $0x10] sm:$0xff] }
  0x31   : > { %v422_v7 = vpack.c.bf16 %v407_v6, %v406_v4  ;;  %v409_v12 = vld [vmem:[%s2835_s24 + $0x18] sm:$0xff]  ;;  %1001 = vmatprep.subr.bf16.mxu0 %v2512_v9  ;;  %v410_v18 = vld [vmem:[%s2835_s24 + $0x20] sm:$0xff]  ;;  %v411_v19 = vld [vmem:[%s2835_s24 + $0x28] sm:$0xff] }
  0x32   : > { %v2871_v15 = vpack.c.bf16 %v409_v12, %v408_v11  ;;  %v2890_v22 = vpack.c.bf16 %v411_v19, %v410_v18  ;;  %v2522_v23 = vld [vmem:[%s3420_s3 + $0x40] ss:$8 sps:$4 sm:$0xff]   ;;  %v412_v24 = vld [vmem:[%s2835_s24 + $0x30] sm:$0xff]  ;;  %v413_v26 = vld [vmem:[%s2835_s24 + $0x38] sm:$0xff] }
  0x33   : > { %2466 = vmatprep.mubr.msk.bf16.mxu1 %vm470_vm0, %v422_v7  ;;  %2257 = vmatmul.mubr.msk.bf16.vlgmr.msra.gmra.mrb[0].mxu0 %vm470_vm0, %v422_v7  ;;  %v2527_v25 = vld [vmem:[%s3420_s3 + $0x54] ss:$8 sps:$4 sm:$0xff]   ;;  %v2525_v27 = vld [vmem:[%s3420_s3 + $0x50] ss:$8 sps:$4 sm:$0xff]   ;;  %v2530_v28 = vld [vmem:[%s3420_s3 + $0x64] ss:$8 sps:$4 sm:$0xff]   ;;  %v2909_v29 = vpack.c.bf16 %v413_v26, %v412_v24 }
  0x34   : > { %537 = vmatprep.mubr.bf16.mxu0 %v2715_v0  ;;  %1002 = vmatpush1.bf16.msra.mxu0 %v2510_v8  ;;  %v2528_v30 = vld [vmem:[%s3420_s3 + $0x60] ss:$8 sps:$4 sm:$0xff]   ;;  %v2533_v31 = vld [vmem:[%s3420_s3 + $0x74] ss:$8 sps:$4 sm:$0xff]   ;;  %v2531_v34 = vld [vmem:[%s3420_s3 + $0x70] ss:$8 sps:$4 sm:$0xff]  }
  0x35   : > { %1003 = vmatprep.subr.bf16.mxu0 %v2515_v10  ;;  %v414_v32 = vld [vmem:[%s2835_s24 + $0x40] sm:$0xff]  ;;  %v415_v33 = vld [vmem:[%s2835_s24 + $0x48] sm:$0xff]  ;;  %v2539_v38 = vld [vmem:[%s3420_s3 + $0x94] ss:$8 sps:$4 sm:$0xff]  }
  0x36   : > { %v2536_v35 = vld [vmem:[%s3420_s3 + $0x84] ss:$8 sps:$4 sm:$0xff]   ;;  %v2928_v36 = vpack.c.bf16 %v415_v33, %v414_v32  ;;  %v2534_v37 = vld [vmem:[%s3420_s3 + $0x80] ss:$8 sps:$4 sm:$0xff]   ;;  %v416_v39 = vld [vmem:[%s2835_s24 + $0x50] sm:$0xff] }
  0x37   : > { %v417_v40 = vld [vmem:[%s2835_s24 + $0x58] sm:$0xff]  ;;  %v2542_v42 = vld [vmem:[%s3420_s3 + $0xa4] ss:$8 sps:$4 sm:$0xff]   ;;  %v2540_v44 = vld [vmem:[%s3420_s3 + $0xa0] ss:$8 sps:$4 sm:$0xff]  }
  0x38   : > { %1004 = vmatpush1.bf16.msra.mxu0 %v2513_v13  ;;  %v2537_v41 = vld [vmem:[%s3420_s3 + $0x90] ss:$8 sps:$4 sm:$0xff]   ;;  %v2947_v43 = vpack.c.bf16 %v417_v40, %v416_v39  ;;  %v2545_v45 = vld [vmem:[%s3420_s3 + $0xb4] ss:$8 sps:$4 sm:$0xff]   ;;  %v418_v46 = vld [vmem:[%s2835_s24 + $0x60] sm:$0xff] }
  0x39   : > { %1005 = vmatprep.subr.bf16.mxu0 %v2518_v14  ;;  %v419_v47 = vld [vmem:[%s2835_s24 + $0x68] sm:$0xff]  ;;  %v2543_v48 = vld [vmem:[%s3420_s3 + $0xb0] ss:$8 sps:$4 sm:$0xff]   ;;  %v2551_v52 = vld [vmem:[%s3420_s3 + $0xd4] ss:$8 sps:$4 sm:$0xff]  }
  0x3a   : > { %v2548_v49 = vld [vmem:[%s3420_s3 + $0xc4] ss:$8 sps:$4 sm:$0xff]   ;;  %v428_v50 = vpack.c.bf16 %v419_v47, %v418_v46  ;;  %v2546_v51 = vld [vmem:[%s3420_s3 + $0xc0] ss:$8 sps:$4 sm:$0xff]   ;;  %v420_v53 = vld [vmem:[%s2835_s24 + $0x70] sm:$0xff] }
  0x3b   : > { %2258 = vmatmul.mubr.msk.bf16.gmra.mrb[4].mxu0 %vm470_vm0, %v2871_v15  ;;  %v421_v54 = vld [vmem:[%s2835_s24 + $0x78] sm:$0xff]  ;;  %v2554_v57 = vld [vmem:[%s3420_s3 + $0xe4] ss:$8 sps:$4 sm:$0xff]   ;;  %v2552_v58 = vld [vmem:[%s3420_s3 + $0xe0] ss:$8 sps:$4 sm:$0xff]  }
  0x3c   : > { %547 = vmatprep.mubr.bf16.mxu0 %v2715_v0  ;;  %1006 = vmatpush1.bf16.msra.mxu0 %v2516_v16  ;;  %v2549_v55 = vld [vmem:[%s3420_s3 + $0xd0] ss:$8 sps:$4 sm:$0xff]   ;;  %v429_v56 = vpack.c.bf16 %v421_v54, %v420_v53  ;;  %v2557_v59 = vld [vmem:[%s3420_s3 + $0xf4] ss:$8 sps:$4 sm:$0xff]   ;;  %v2559_v62 = vld [vmem:[%s3418_s1 + $0x20] ss:$12 sps:$4 sm:$0xff]  }
  0x3d   : > { %1007 = vmatprep.subr.bf16.mxu0 %v2521_v17  ;;  %v2555_v60 = vld [vmem:[%s3420_s3 + $0xf0] ss:$8 sps:$4 sm:$0xff]   ;;  %v2558_v61 = vld [vmem:[%s3418_s1 + $0x8] ss:$12 sps:$4 sm:$0xff]   ;;  %v2562_v63 = vld [vmem:[%s3422_s5 + $0x4] ss:$8 sps:$4 sm:$0xff]  }
  0x3e   : > { %2462 = vmatprep.subr.bf16.mxu1 %v2558_v61  ;;  %v2565_v1 = vld [vmem:[%s3422_s5 + $0x14] ss:$8 sps:$4 sm:$0xff]   ;;  %v2563_v2 = vld [vmem:[%s3422_s5 + $0x10] ss:$8 sps:$4 sm:$0xff]   ;;  %v2568_v3 = vld [vmem:[%s3422_s5 + $0x24] ss:$8 sps:$4 sm:$0xff]  }
  0x3f   : > { %2463 = vmatpush3.bf16.msra.mxu1 %v2558_v61  ;;  %v2566_v4 = vld [vmem:[%s3422_s5 + $0x20] ss:$8 sps:$4 sm:$0xff]   ;;  %v2571_v5 = vld [vmem:[%s3422_s5 + $0x34] ss:$8 sps:$4 sm:$0xff]   ;;  %v2569_v6 = vld [vmem:[%s3422_s5 + $0x30] ss:$8 sps:$4 sm:$0xff]  }
  0x40   : > { %1008 = vmatpush1.bf16.msra.mxu0 %v2519_v20  ;;  %2464 = vmatprep.subr.bf16.mxu1 %v2559_v62  ;;  %v2574_v7 = vld [vmem:[%s3422_s5 + $0x44] ss:$8 sps:$4 sm:$0xff]   ;;  %v2572_v8 = vld [vmem:[%s3422_s5 + $0x40] ss:$8 sps:$4 sm:$0xff]   ;;  %v2577_v9 = vld [vmem:[%s3422_s5 + $0x54] ss:$8 sps:$4 sm:$0xff]   ;;  %v707_v20 = vlaneseq }
  0x41   : > { %1009 = vmatprep.subr.bf16.mxu0 %v2524_v21  ;;  %v2575_v10 = vld [vmem:[%s3422_s5 + $0x50] ss:$8 sps:$4 sm:$0xff]   ;;  %v2580_v11 = vld [vmem:[%s3422_s5 + $0x64] ss:$8 sps:$4 sm:$0xff]   ;;  %v2578_v12 = vld [vmem:[%s3422_s5 + $0x60] ss:$8 sps:$4 sm:$0xff]  }
  0x42   : > { %v2583_v13 = vld [vmem:[%s3422_s5 + $0x74] ss:$8 sps:$4 sm:$0xff]   ;;  %v2581_v14 = vld [vmem:[%s3422_s5 + $0x70] ss:$8 sps:$4 sm:$0xff]   ;;  %v2584_v16 = vld [vmem:[%s3422_s5 + $0x80] ss:$8 sps:$4 sm:$0xff]  }
  0x43   : > { %2259 = vmatmul.mubr.msk.bf16.gmra.mrb[8].mxu0 %vm470_vm0, %v2890_v22  ;;  %2465 = vmatpush3.bf16.msra.mxu1 %v2559_v62  ;;  %v2589_v17 = vld [vmem:[%s3422_s5 + $0x94] ss:$8 sps:$4 sm:$0xff]   ;;  %v2587_v18 = vld [vmem:[%s3422_s5 + $0x90] ss:$8 sps:$4 sm:$0xff]   ;;  %v2592_v19 = vld [vmem:[%s3422_s5 + $0xa4] ss:$8 sps:$4 sm:$0xff]  }
  0x44   : > { %557 = vmatprep.mubr.bf16.mxu0 %v2715_v0  ;;  %1010 = vmatpush1.bf16.msra.mxu0 %v2522_v23  ;;  %v2590_v21 = vld [vmem:[%s3422_s5 + $0xa0] ss:$8 sps:$4 sm:$0xff]   ;;  %v708_v23 = vshrl.u32 %v707_v20, 7  ;;  %v2593_v24 = vld [vmem:[%s3422_s5 + $0xb0] ss:$8 sps:$4 sm:$0xff]  }
  0x45   : > { %1011 = vmatprep.subr.bf16.mxu0 %v2527_v25  ;;  %1366 = vmatprep.subr.bf16.mxu1 %v2562_v63  ;;  %v2598_v25 = vld [vmem:[%s3422_s5 + $0xc4] ss:$8 sps:$4 sm:$0xff]   ;;  %v2599_v33 = vld [vmem:[%s3422_s5 + $0xd0] ss:$8 sps:$4 sm:$0xff]  }
  0x46   : > { %2467 = vmatmul.mubr.msk.bf16.vlgmr.msra.gmra.mrb[0].mxu1 %vm470_vm0, %v2871_v15  ;;  %v2586_v15 = vld [vmem:[%s3422_s5 + $0x84] ss:$8 sps:$4 sm:$0xff]   ;;  %v3085_v26 = vsub.s32 0, %v708_v23 }
  0x47   : > { %2470 = vmatprep.mubr.msk.bf16.mxu1 %vm470_vm0, %v2890_v22  ;;  %v2595_v22 = vld [vmem:[%s3422_s5 + $0xb4] ss:$8 sps:$4 sm:$0xff]  }
  0x48   : > { %1012 = vmatpush1.bf16.msra.mxu0 %v2525_v27  ;;  %v705_v27 = vld [vmem:[%s3419_s2] sm:$0x3] }
  0x49   : > { %1013 = vmatprep.subr.bf16.mxu0 %v2530_v28  ;;  %v3090_v28 = vsub.s32 1, %v708_v23 }
  0x4b   : > { %2260 = vmatmul.mubr.msk.bf16.gmra.mrb[12].mxu0 %vm470_vm0, %v2909_v29  ;;  %v3102_v32 = vrot.slane %v705_v27, %v3090_v28 }
  0x4c   : > { %567 = vmatprep.mubr.bf16.mxu0 %v2715_v0  ;;  %1014 = vmatpush1.bf16.msra.mxu0 %v2528_v30  ;;  %v2601_v30 = vld [vmem:[%s3422_s5 + $0xd4] ss:$8 sps:$4 sm:$0xff]  }
  0x4d   : > { %1015 = vmatprep.subr.bf16.mxu0 %v2533_v31  ;;  %v3099_v31 = vrot.slane %v705_v27, %v3085_v26 }
  0x4e   : > { %2471 = vmatmul.mubr.msk.bf16.gmra.mrb[4].mxu1 %vm470_vm0, %v2909_v29  ;;  %v2596_v29 = vld [vmem:[%s3422_s5 + $0xc0] ss:$8 sps:$4 sm:$0xff]  }
  0x4f   : > { %2474 = vmatprep.mubr.msk.bf16.mxu1 %vm470_vm0, %v2928_v36 }
  0x50   : > { %1016 = vmatpush1.bf16.msra.mxu0 %v2531_v34 }
  0x51   : > { %1017 = vmatprep.subr.bf16.mxu0 %v2536_v35 }
  0x53   : > { %2261 = vmatmul.mubr.msk.bf16.gmra.mrb[16].mxu0 %vm470_vm0, %v2928_v36 }
  0x54   : > { %577 = vmatprep.mubr.bf16.mxu0 %v2715_v0  ;;  %1018 = vmatpush1.bf16.msra.mxu0 %v2534_v37 }
  0x55   : > { %1019 = vmatprep.subr.bf16.mxu0 %v2539_v38 }
  0x56   : > { %2475 = vmatmul.mubr.msk.bf16.gmra.mrb[8].mxu1 %vm470_vm0, %v2947_v43 }
  0x57   : > { %2478 = vmatprep.mubr.msk.bf16.mxu1 %vm470_vm0, %v428_v50 }
  0x58   : > { %1020 = vmatpush1.bf16.msra.mxu0 %v2537_v41 }
  0x59   : > { %1021 = vmatprep.subr.bf16.mxu0 %v2542_v42 }
  0x5b   : > { %2262 = vmatmul.mubr.msk.bf16.gmra.mrb[20].mxu0 %vm470_vm0, %v2947_v43 }
  0x5c   : > { %587 = vmatprep.mubr.bf16.mxu0 %v2715_v0  ;;  %1022 = vmatpush1.bf16.msra.mxu0 %v2540_v44 }
  0x5d   : > { %1023 = vmatprep.subr.bf16.mxu0 %v2545_v45 }
  0x5e   : > { %2479 = vmatmul.mubr.msk.bf16.gmra.mrb[12].mxu1 %vm470_vm0, %v429_v56 }
  0x60   : > { %1024 = vmatpush1.bf16.msra.mxu0 %v2543_v48 }
  0x61   : > { %1025 = vmatprep.subr.bf16.mxu0 %v2548_v49 }
  0x63   : > { %2263 = vmatmul.mubr.msk.bf16.gmra.mrb[24].mxu0 %vm470_vm0, %v428_v50 }
  0x64   : > { %597 = vmatprep.mubr.bf16.mxu0 %v2715_v0  ;;  %1026 = vmatpush1.bf16.msra.mxu0 %v2546_v51  ;;  %v2560_v0 = vld [vmem:[%s3422_s5] ss:$8 sps:$4 sm:$0xff]  }
  0x65   : > { %1027 = vmatprep.subr.bf16.mxu0 %v2551_v52  ;;  %1367 = vmatpush1.bf16.msra.mxu1 %v2560_v0 }
  0x66   : > { %1368 = vmatprep.subr.bf16.mxu1 %v2565_v1 }
  0x68   : > { %1028 = vmatpush1.bf16.msra.mxu0 %v2549_v55 }
  0x69   : > { %1029 = vmatprep.subr.bf16.mxu0 %v2554_v57  ;;  %1369 = vmatpush1.bf16.msra.mxu1 %v2563_v2 }
  0x6a   : > { %1370 = vmatprep.subr.bf16.mxu1 %v2568_v3 }
  0x6b   : > { %2264 = vmatmul.mubr.msk.bf16.gmra.mrb[28].mxu0 %vm470_vm0, %v429_v56 }
  0x6c   : > { %1030 = vmatpush1.bf16.msra.mxu0 %v2552_v58 }
  0x6d   : > { %1031 = vmatprep.subr.bf16.mxu0 %v2557_v59  ;;  %1371 = vmatpush1.bf16.msra.mxu1 %v2566_v4 }
  0x6e   : > { %1372 = vmatprep.subr.bf16.mxu1 %v2571_v5 }
  0x70   : > { %1032 = vmatpush1.bf16.msra.mxu0 %v2555_v60 }
  0x71   : > { %1373 = vmatpush1.bf16.msra.mxu1 %v2569_v6 }
  0x72   : > { %1374 = vmatprep.subr.bf16.mxu1 %v2574_v7 }
  0x75   : > { %1375 = vmatpush1.bf16.msra.mxu1 %v2572_v8 }
  0x76   : > { %1376 = vmatprep.subr.bf16.mxu1 %v2577_v9 }
  0x79   : > { %1377 = vmatpush1.bf16.msra.mxu1 %v2575_v10 }
  0x7a   : > { %1378 = vmatprep.subr.bf16.mxu1 %v2580_v11 }
  0x7d   : > { %1379 = vmatpush1.bf16.msra.mxu1 %v2578_v12 }
  0x7e   : > { %1380 = vmatprep.subr.bf16.mxu1 %v2583_v13 }
  0x81   : > { %1381 = vmatpush1.bf16.msra.mxu1 %v2581_v14 }
  0x82   : > { %1382 = vmatprep.subr.bf16.mxu1 %v2586_v15 }
  0x85   : > { %1383 = vmatpush1.bf16.msra.mxu1 %v2584_v16 }
  0x86   : > { %1384 = vmatprep.subr.bf16.mxu1 %v2589_v17 }
  0x89   : > { %1385 = vmatpush1.bf16.msra.mxu1 %v2587_v18 }
  0x8a   : > { %1386 = vmatprep.subr.bf16.mxu1 %v2592_v19 }
  0x8d   : > { %1387 = vmatpush1.bf16.msra.mxu1 %v2590_v21 }
  0x8e   : > { %1388 = vmatprep.subr.bf16.mxu1 %v2595_v22 }
  0x91   : > { %1389 = vmatpush1.bf16.msra.mxu1 %v2593_v24 }
  0x92   : > { %1390 = vmatprep.subr.bf16.mxu1 %v2598_v25 }
  0x95   : > { %1391 = vmatpush1.bf16.msra.mxu1 %v2596_v29 }
  0x96   : > { %1392 = vmatprep.subr.bf16.mxu1 %v2601_v30 }
  0x99   : > { %1393 = vmatpush1.bf16.msra.mxu1 %v2599_v33 }
 0x106   : > { %v529_v34 = vpop.f32.mrb[0].mxu0 }
 0x107   : > { %v717_v35 = vadd.f32 %v3099_v31, %v529_v34  ;;  %v531_v36 = vpop.f32.mrb[1].mxu0 }
 0x108   : > { %v718_v37 = vadd.f32 %v3102_v32, %v531_v36  ;;  %v533_v38 = vpop.f32.mrb[2].mxu0 }
 0x109   : > { %v719_v39 = vadd.f32 %v3099_v31, %v533_v38  ;;  %v535_v40 = vpop.f32.mrb[3].mxu0  ;;  %v749_v42 = vmax.f32 %v717_v35, 0.0 }
 0x10a   : > { %v720_v41 = vadd.f32 %v3102_v32, %v535_v40  ;;  %v750_v44 = vmax.f32 %v718_v37, 0.0 }
 0x10b   : > { %v751_v43 = vmax.f32 %v719_v39, 0.0 }
 0x10c   : > { %v752_v45 = vmax.f32 %v720_v41, 0.0 }
 0x10d   : > { %v781_v46 = vpack.c.bf16 %v751_v43, %v749_v42 }
 0x10e   : > { %v782_v47 = vpack.c.bf16 %v752_v45, %v750_v44  ;;  %v539_v48 = vpop.f32.mrb[4].mxu0 }
 0x10f   : > { %v721_v49 = vadd.f32 %v3099_v31, %v539_v48  ;;  %v541_v50 = vpop.f32.mrb[5].mxu0 }
 0x110   : > { %v722_v51 = vadd.f32 %v3102_v32, %v541_v50  ;;  %v543_v52 = vpop.f32.mrb[6].mxu0  ;;  %1033 = vmatprep.mubr.bf16.mxu0 %v782_v47 }
 0x111   : > { %v723_v53 = vadd.f32 %v3099_v31, %v543_v52  ;;  %v545_v54 = vpop.f32.mrb[7].mxu0  ;;  %1034 = vmatmul.mubr.bf16.vlgmr.msra.gmra.mrb[32].mxu0 %v781_v46  ;;  %v753_v56 = vmax.f32 %v721_v49, 0.0 }
 0x112   : > { %v724_v55 = vadd.f32 %v3102_v32, %v545_v54  ;;  %v754_v58 = vmax.f32 %v722_v51, 0.0 }
 0x113   : > { %v755_v57 = vmax.f32 %v723_v53, 0.0 }
 0x114   : > { %v756_v59 = vmax.f32 %v724_v55, 0.0 }
 0x115   : > { %v783_v60 = vpack.c.bf16 %v755_v57, %v753_v56 }
 0x116   : > { %v784_v61 = vpack.c.bf16 %v756_v59, %v754_v58  ;;  %v549_v62 = vpop.f32.mrb[8].mxu0 }
 0x117   : > { %v725_v63 = vadd.f32 %v3099_v31, %v549_v62  ;;  %v551_v0 = vpop.f32.mrb[9].mxu0 }
 0x118   : > { %v726_v1 = vadd.f32 %v3102_v32, %v551_v0  ;;  %v553_v2 = vpop.f32.mrb[10].mxu0  ;;  %1043 = vmatprep.mubr.bf16.mxu0 %v784_v61 }
 0x119   : > { %v727_v3 = vadd.f32 %v3099_v31, %v553_v2  ;;  %v555_v4 = vpop.f32.mrb[11].mxu0  ;;  %1044 = vmatmul.mubr.bf16.gmra.mrb[36].mxu0 %v783_v60  ;;  %v757_v6 = vmax.f32 %v725_v63, 0.0 }
 0x11a   : > { %v728_v5 = vadd.f32 %v3102_v32, %v555_v4  ;;  %v758_v8 = vmax.f32 %v726_v1, 0.0 }
 0x11b   : > { %v759_v7 = vmax.f32 %v727_v3, 0.0 }
 0x11c   : > { %v760_v9 = vmax.f32 %v728_v5, 0.0 }
 0x11d   : > { %v785_v10 = vpack.c.bf16 %v759_v7, %v757_v6 }
 0x11e   : > { %v786_v11 = vpack.c.bf16 %v760_v9, %v758_v8  ;;  %v559_v12 = vpop.f32.mrb[12].mxu0 }
 0x11f   : > { %v729_v13 = vadd.f32 %v3099_v31, %v559_v12  ;;  %v561_v14 = vpop.f32.mrb[13].mxu0 }
 0x120   : > { %v730_v15 = vadd.f32 %v3102_v32, %v561_v14  ;;  %v563_v16 = vpop.f32.mrb[14].mxu0  ;;  %1053 = vmatprep.mubr.bf16.mxu0 %v786_v11 }
 0x121   : > { %v731_v17 = vadd.f32 %v3099_v31, %v563_v16  ;;  %v565_v18 = vpop.f32.mrb[15].mxu0  ;;  %1054 = vmatmul.mubr.bf16.gmra.mrb[40].mxu0 %v785_v10  ;;  %v761_v20 = vmax.f32 %v729_v13, 0.0 }
 0x122   : > { %v732_v19 = vadd.f32 %v3102_v32, %v565_v18  ;;  %v762_v22 = vmax.f32 %v730_v15, 0.0 }
 0x123   : > { %v763_v21 = vmax.f32 %v731_v17, 0.0 }
 0x124   : > { %v764_v23 = vmax.f32 %v732_v19, 0.0 }
 0x125   : > { %v787_v24 = vpack.c.bf16 %v763_v21, %v761_v20 }
 0x126   : > { %v788_v25 = vpack.c.bf16 %v764_v23, %v762_v22  ;;  %v569_v27 = vpop.f32.mrb[16].mxu0  ;;  %v2604_v22 = vld [vmem:[%s3422_s5 + $0xe4] ss:$8 sps:$4 sm:$0xff]   ;;  %v2605_v23 = vld [vmem:[%s3422_s5 + $0xf0] ss:$8 sps:$4 sm:$0xff]  }
 0x127   : > { %v733_v29 = vadd.f32 %v3099_v31, %v569_v27  ;;  %v571_v30 = vpop.f32.mrb[17].mxu0  ;;  %1394 = vmatprep.subr.bf16.mxu1 %v2604_v22  ;;  %v2610_v27 = vld [vmem:[#allocation2 + $0x4] ss:$8 sps:$4 sm:$0xff]  }
 0x128   : > { %v734_v33 = vadd.f32 %v3102_v32, %v571_v30  ;;  %v573_v34 = vpop.f32.mrb[18].mxu0  ;;  %1063 = vmatprep.mubr.bf16.mxu0 %v788_v25  ;;  %v2608_v25 = vld [vmem:[#allocation2] ss:$8 sps:$4 sm:$0xff]   ;;  %v2613_v30 = vld [vmem:[#allocation2 + $0x14] ss:$8 sps:$4 sm:$0xff]   ;;  %1731 = vmatprep.subr.bf16.mxu0 %v2610_v27 }
 0x129   : > { %v735_v35 = vadd.f32 %v3099_v31, %v573_v34  ;;  %v575_v36 = vpop.f32.mrb[19].mxu0  ;;  %1064 = vmatmul.mubr.bf16.gmra.mrb[44].mxu0 %v787_v24  ;;  %v765_v38 = vmax.f32 %v733_v29, 0.0  ;;  %v3151_v24 = vpop.f32.mrb[0].mxu1 }
 0x12a   : > { %v736_v37 = vadd.f32 %v3102_v32, %v575_v36  ;;  %v766_v40 = vmax.f32 %v734_v33, 0.0  ;;  %v3153_v29 = vpop.f32.mrb[1].mxu1  ;;  %1732 = vmatpush1.bf16.msra.mxu0 %v2608_v25  ;;  %v2616_v36 = vld [vmem:[#allocation2 + $0x24] ss:$8 sps:$4 sm:$0xff]  }
 0x12b   : > { %v767_v39 = vmax.f32 %v735_v35, 0.0  ;;  %v3155_v33 = vpop.f32.mrb[2].mxu1  ;;  %v2611_v35 = vld [vmem:[#allocation2 + $0x10] ss:$8 sps:$4 sm:$0xff]   ;;  %1733 = vmatprep.subr.bf16.mxu0 %v2613_v30 }
 0x12c   : > { %v768_v41 = vmax.f32 %v736_v37, 0.0  ;;  %v3157_v34 = vpop.f32.mrb[3].mxu1  ;;  %v2614_v37 = vld [vmem:[#allocation2 + $0x20] ss:$8 sps:$4 sm:$0xff]  }
 0x12d   : > { %v789_v42 = vpack.c.bf16 %v767_v39, %v765_v38  ;;  %v3159_v38 = vpop.f32.mrb[4].mxu1  ;;  %v2619_v39 = vld [vmem:[#allocation2 + $0x34] ss:$8 sps:$4 sm:$0xff]  }
 0x12e   : > { %v790_v43 = vpack.c.bf16 %v768_v41, %v766_v40  ;;  %v579_v44 = vpop.f32.mrb[20].mxu0  ;;  %1734 = vmatpush1.bf16.msra.mxu0 %v2611_v35  ;;  %v3161_v40 = vpop.f32.mrb[5].mxu1 }
 0x12f   : > { %v737_v45 = vadd.f32 %v3099_v31, %v579_v44  ;;  %v581_v46 = vpop.f32.mrb[21].mxu0  ;;  %1735 = vmatprep.subr.bf16.mxu0 %v2616_v36  ;;  %v3163_v41 = vpop.f32.mrb[6].mxu1  ;;  %v2622_v44 = vld [vmem:[#allocation2 + $0x44] ss:$8 sps:$4 sm:$0xff]  }
 0x130   : > { %v738_v47 = vadd.f32 %v3102_v32, %v581_v46  ;;  %v583_v48 = vpop.f32.mrb[22].mxu0  ;;  %1073 = vmatprep.mubr.bf16.mxu0 %v790_v43  ;;  %v2617_v43 = vld [vmem:[#allocation2 + $0x30] ss:$8 sps:$4 sm:$0xff]  }
 0x131   : > { %v739_v49 = vadd.f32 %v3099_v31, %v583_v48  ;;  %v585_v50 = vpop.f32.mrb[23].mxu0  ;;  %1074 = vmatmul.mubr.bf16.gmra.mrb[48].mxu0 %v789_v42  ;;  %v769_v52 = vmax.f32 %v737_v45, 0.0  ;;  %v3165_v42 = vpop.f32.mrb[7].mxu1  ;;  %v2620_v45 = vld [vmem:[#allocation2 + $0x40] ss:$8 sps:$4 sm:$0xff]  }
 0x132   : > { %v740_v51 = vadd.f32 %v3102_v32, %v585_v50  ;;  %v770_v54 = vmax.f32 %v738_v47, 0.0  ;;  %1736 = vmatpush1.bf16.msra.mxu0 %v2614_v37  ;;  %v3167_v46 = vpop.f32.mrb[8].mxu1  ;;  %v2625_v47 = vld [vmem:[#allocation2 + $0x54] ss:$8 sps:$4 sm:$0xff]  }
 0x133   : > { %v771_v53 = vmax.f32 %v739_v49, 0.0  ;;  %1737 = vmatprep.subr.bf16.mxu0 %v2619_v39  ;;  %v3169_v48 = vpop.f32.mrb[9].mxu1 }
 0x134   : > { %v772_v55 = vmax.f32 %v740_v51, 0.0  ;;  %v3171_v49 = vpop.f32.mrb[10].mxu1  ;;  %v2623_v51 = vld [vmem:[#allocation2 + $0x50] ss:$8 sps:$4 sm:$0xff]  }
 0x135   : > { %v791_v56 = vpack.c.bf16 %v771_v53, %v769_v52  ;;  %v3173_v50 = vpop.f32.mrb[11].mxu1  ;;  %v2628_v52 = vld [vmem:[#allocation2 + $0x64] ss:$8 sps:$4 sm:$0xff]   ;;  %v2626_v53 = vld [vmem:[#allocation2 + $0x60] ss:$8 sps:$4 sm:$0xff]  }
 0x136   : > { %v792_v57 = vpack.c.bf16 %v772_v55, %v770_v54  ;;  %v589_v58 = vpop.f32.mrb[24].mxu0  ;;  %1738 = vmatpush1.bf16.msra.mxu0 %v2617_v43  ;;  %v3175_v54 = vpop.f32.mrb[12].mxu1  ;;  %v2631_v55 = vld [vmem:[#allocation2 + $0x74] ss:$8 sps:$4 sm:$0xff]  }
 0x137   : > { %v741_v59 = vadd.f32 %v3099_v31, %v589_v58  ;;  %v591_v60 = vpop.f32.mrb[25].mxu0  ;;  %1739 = vmatprep.subr.bf16.mxu0 %v2622_v44 }
 0x138   : > { %v742_v61 = vadd.f32 %v3102_v32, %v591_v60  ;;  %v593_v62 = vpop.f32.mrb[26].mxu0  ;;  %1083 = vmatprep.mubr.bf16.mxu0 %v792_v57  ;;  %v2634_v60 = vld [vmem:[#allocation2 + $0x84] ss:$8 sps:$4 sm:$0xff]  }
 0x139   : > { %v743_v63 = vadd.f32 %v3099_v31, %v593_v62  ;;  %v595_v0 = vpop.f32.mrb[27].mxu0  ;;  %1084 = vmatmul.mubr.bf16.gmra.mrb[52].mxu0 %v791_v56  ;;  %v773_v2 = vmax.f32 %v741_v59, 0.0  ;;  %v3177_v56 = vpop.f32.mrb[13].mxu1  ;;  %v2629_v59 = vld [vmem:[#allocation2 + $0x70] ss:$8 sps:$4 sm:$0xff]  }
 0x13a   : > { %v744_v1 = vadd.f32 %v3102_v32, %v595_v0  ;;  %v774_v4 = vmax.f32 %v742_v61, 0.0  ;;  %1740 = vmatpush1.bf16.msra.mxu0 %v2620_v45  ;;  %v3179_v57 = vpop.f32.mrb[14].mxu1  ;;  %v2632_v61 = vld [vmem:[#allocation2 + $0x80] ss:$8 sps:$4 sm:$0xff]   ;;  %v2637_v62 = vld [vmem:[#allocation2 + $0x94] ss:$8 sps:$4 sm:$0xff]  }
 0x13b   : > { %v775_v3 = vmax.f32 %v743_v63, 0.0  ;;  %1741 = vmatprep.subr.bf16.mxu0 %v2625_v47  ;;  %v3181_v58 = vpop.f32.mrb[15].mxu1  ;;  %v2635_v63 = vld [vmem:[#allocation2 + $0x90] ss:$8 sps:$4 sm:$0xff]   ;;  %v2640_v0 = vld [vmem:[#allocation2 + $0xa4] ss:$8 sps:$4 sm:$0xff]  }
 0x13c   : > { %v776_v5 = vmax.f32 %v744_v1, 0.0  ;;  %v2638_v1 = vld [vmem:[#allocation2 + $0xa0] ss:$8 sps:$4 sm:$0xff]  }
 0x13d   : > { %v793_v6 = vpack.c.bf16 %v775_v3, %v773_v2  ;;  %v2643_v2 = vld [vmem:[#allocation2 + $0xb4] ss:$8 sps:$4 sm:$0xff]   ;;  %v2641_v3 = vld [vmem:[#allocation2 + $0xb0] ss:$8 sps:$4 sm:$0xff]  }
 0x13e   : > { %v794_v7 = vpack.c.bf16 %v776_v5, %v774_v4  ;;  %v599_v8 = vpop.f32.mrb[28].mxu0  ;;  %1742 = vmatpush1.bf16.msra.mxu0 %v2623_v51  ;;  %v2646_v4 = vld [vmem:[#allocation2 + $0xc4] ss:$8 sps:$4 sm:$0xff]   ;;  %v2644_v5 = vld [vmem:[#allocation2 + $0xc0] ss:$8 sps:$4 sm:$0xff]  }
 0x13f   : > { %v745_v9 = vadd.f32 %v3099_v31, %v599_v8  ;;  %v601_v10 = vpop.f32.mrb[29].mxu0  ;;  %1743 = vmatprep.subr.bf16.mxu0 %v2628_v52  ;;  %v829_v8 = vld [vmem:[%s3421_s4] sm:$0x3] }
 0x140   : > { %v746_v11 = vadd.f32 %v3102_v32, %v601_v10  ;;  %v603_v12 = vpop.f32.mrb[30].mxu0  ;;  %1093 = vmatprep.mubr.bf16.mxu0 %v794_v7  ;;  %v2647_v7 = vld [vmem:[#allocation2 + $0xd0] ss:$8 sps:$4 sm:$0xff]   ;;  %v3190_v10 = vrot.slane %v829_v8, %v3090_v28 }
 0x141   : > { %v747_v13 = vadd.f32 %v3099_v31, %v603_v12  ;;  %v605_v14 = vpop.f32.mrb[31].mxu0  ;;  %1094 = vmatmul.mubr.bf16.gmra.mrb[56].mxu0 %v793_v6  ;;  %v777_v16 = vmax.f32 %v745_v9, 0.0  ;;  %v2602_v31 = vld [vmem:[%s3422_s5 + $0xe0] ss:$8 sps:$4 sm:$0xff]   ;;  %v2649_v6 = vld [vmem:[#allocation2 + $0xd4] ss:$8 sps:$4 sm:$0xff]   ;;  %v3187_v9 = vrot.slane %v829_v8, %v3085_v26 }
 0x142   : > { %v748_v15 = vadd.f32 %v3102_v32, %v605_v14  ;;  %v778_v18 = vmax.f32 %v746_v11, 0.0  ;;  %1395 = vmatpush1.bf16.msra.mxu1 %v2602_v31  ;;  %v2607_v32 = vld [vmem:[%s3422_s5 + $0xf4] ss:$8 sps:$4 sm:$0xff]   ;;  %1744 = vmatpush1.bf16.msra.mxu0 %v2626_v53 }
 0x143   : > { %v779_v17 = vmax.f32 %v747_v13, 0.0  ;;  %1396 = vmatprep.subr.bf16.mxu1 %v2607_v32  ;;  %1745 = vmatprep.subr.bf16.mxu0 %v2631_v55 }
 0x144   : > { %v780_v19 = vmax.f32 %v748_v15, 0.0 }
 0x145   : > { %v795_v20 = vpack.c.bf16 %v779_v17, %v777_v16 }
 0x146   : > { %v796_v21 = vpack.c.bf16 %v780_v19, %v778_v18  ;;  %1397 = vmatpush1.bf16.msra.mxu1 %v2605_v23  ;;  %1746 = vmatpush1.bf16.msra.mxu0 %v2629_v59 }
 0x147   : > { %1747 = vmatprep.subr.bf16.mxu0 %v2634_v60 }
 0x148   : > { %1103 = vmatprep.mubr.bf16.mxu0 %v796_v21 }
 0x149   : > { %1104 = vmatmul.mubr.bf16.gmra.mrb[60].mxu0 %v795_v20 }
 0x14a   : > { %1748 = vmatpush1.bf16.msra.mxu0 %v2632_v61 }
 0x14b   : > { %1749 = vmatprep.subr.bf16.mxu0 %v2637_v62 }
 0x14e   : > { %1750 = vmatpush1.bf16.msra.mxu0 %v2635_v63 }
 0x14f   : > { %1751 = vmatprep.subr.bf16.mxu0 %v2640_v0 }
 0x152   : > { %1752 = vmatpush1.bf16.msra.mxu0 %v2638_v1 }
 0x153   : > { %1753 = vmatprep.subr.bf16.mxu0 %v2643_v2 }
 0x156   : > { %1754 = vmatpush1.bf16.msra.mxu0 %v2641_v3 }
 0x157   : > { %1755 = vmatprep.subr.bf16.mxu0 %v2646_v4 }
 0x15a   : > { %1756 = vmatpush1.bf16.msra.mxu0 %v2644_v5 }
 0x15b   : > { %1757 = vmatprep.subr.bf16.mxu0 %v2649_v6 }
 0x15e   : > { %1758 = vmatpush1.bf16.msra.mxu0 %v2647_v7 }
 0x1e4   : > { %v1035_v11 = vpop.f32.mrb[32].mxu0 }
 0x1e5   : > { %v1036_v12 = vadd.f32 %v1035_v11, %v3187_v9  ;;  %v1037_v13 = vpop.f32.mrb[33].mxu0 }
 0x1e6   : > { %v1038_v14 = vadd.f32 %v1037_v13, %v3190_v10  ;;  %v1039_v15 = vpop.f32.mrb[34].mxu0 }
 0x1e7   : > { %v1040_v16 = vadd.f32 %v1039_v15, %v3187_v9  ;;  %v1041_v17 = vpop.f32.mrb[35].mxu0  ;;  %v1114_v19 = vmax.f32 %v1036_v12, 0.0 }
 0x1e8   : > { %v1042_v18 = vadd.f32 %v1041_v17, %v3190_v10  ;;  %v1115_v21 = vmax.f32 %v1038_v14, 0.0 }
 0x1e9   : > { %v1116_v20 = vmax.f32 %v1040_v16, 0.0 }
 0x1ea   : > { %v1117_v22 = vmax.f32 %v1042_v18, 0.0 }
 0x1eb   : > { %v1146_v31 = vpack.c.bf16 %v1116_v20, %v1114_v19 }
 0x1ec   : > { %v1147_v32 = vpack.c.bf16 %v1117_v22, %v1115_v21  ;;  %v1045_v23 = vpop.f32.mrb[36].mxu0 }
 0x1ed   : > { %v1046_v25 = vadd.f32 %v1045_v23, %v3187_v9  ;;  %v1047_v27 = vpop.f32.mrb[37].mxu0 }
 0x1ee   : > { %v1048_v30 = vadd.f32 %v1047_v27, %v3190_v10  ;;  %v1049_v35 = vpop.f32.mrb[38].mxu0  ;;  %1398 = vmatprep.mubr.bf16.mxu1 %v1147_v32 }
 0x1ef   : > { %v1050_v36 = vadd.f32 %v1049_v35, %v3187_v9  ;;  %v1051_v37 = vpop.f32.mrb[39].mxu0  ;;  %1399 = vmatmul.mubr.bf16.vlgmr.msra.gmra.mrb[16].mxu1 %v1146_v31  ;;  %v1118_v43 = vmax.f32 %v1046_v25, 0.0 }
 0x1f0   : > { %v1052_v39 = vadd.f32 %v1051_v37, %v3190_v10  ;;  %v1119_v45 = vmax.f32 %v1048_v30, 0.0 }
 0x1f1   : > { %v1120_v44 = vmax.f32 %v1050_v36, 0.0 }
 0x1f2   : > { %v1121_v47 = vmax.f32 %v1052_v39, 0.0 }
 0x1f3   : > { %v1148_v51 = vpack.c.bf16 %v1120_v44, %v1118_v43 }
 0x1f4   : > { %v1149_v52 = vpack.c.bf16 %v1121_v47, %v1119_v45  ;;  %v1055_v53 = vpop.f32.mrb[40].mxu0 }
 0x1f5   : > { %v1056_v55 = vadd.f32 %v1055_v53, %v3187_v9  ;;  %v1057_v59 = vpop.f32.mrb[41].mxu0 }
 0x1f6   : > { %v1058_v60 = vadd.f32 %v1057_v59, %v3190_v10  ;;  %v1059_v61 = vpop.f32.mrb[42].mxu0  ;;  %1408 = vmatprep.mubr.bf16.mxu1 %v1149_v52 }
 0x1f7   : > { %v1060_v62 = vadd.f32 %v1059_v61, %v3187_v9  ;;  %v1061_v63 = vpop.f32.mrb[43].mxu0  ;;  %1409 = vmatmul.mubr.bf16.gmra.mrb[20].mxu1 %v1148_v51  ;;  %v1122_v1 = vmax.f32 %v1056_v55, 0.0 }
 0x1f8   : > { %v1062_v0 = vadd.f32 %v1061_v63, %v3190_v10  ;;  %v1123_v3 = vmax.f32 %v1058_v60, 0.0 }
 0x1f9   : > { %v1124_v2 = vmax.f32 %v1060_v62, 0.0 }
 0x1fa   : > { %v1125_v4 = vmax.f32 %v1062_v0, 0.0 }
 0x1fb   : > { %v1150_v5 = vpack.c.bf16 %v1124_v2, %v1122_v1 }
 0x1fc   : > { %v1151_v6 = vpack.c.bf16 %v1125_v4, %v1123_v3  ;;  %v1065_v7 = vpop.f32.mrb[44].mxu0 }
 0x1fd   : > { %v1066_v8 = vadd.f32 %v1065_v7, %v3187_v9  ;;  %v1067_v11 = vpop.f32.mrb[45].mxu0 }
 0x1fe   : > { %v1068_v12 = vadd.f32 %v1067_v11, %v3190_v10  ;;  %v1069_v13 = vpop.f32.mrb[46].mxu0  ;;  %1418 = vmatprep.mubr.bf16.mxu1 %v1151_v6 }
 0x1ff   : > { %v1070_v14 = vadd.f32 %v1069_v13, %v3187_v9  ;;  %v1071_v15 = vpop.f32.mrb[47].mxu0  ;;  %1419 = vmatmul.mubr.bf16.gmra.mrb[24].mxu1 %v1150_v5  ;;  %v1126_v17 = vmax.f32 %v1066_v8, 0.0 }
 0x200   : > { %v1072_v16 = vadd.f32 %v1071_v15, %v3190_v10  ;;  %v1127_v19 = vmax.f32 %v1068_v12, 0.0 }
 0x201   : > { %v1128_v18 = vmax.f32 %v1070_v14, 0.0 }
 0x202   : > { %v1129_v20 = vmax.f32 %v1072_v16, 0.0 }
 0x203   : > { %v1152_v21 = vpack.c.bf16 %v1128_v18, %v1126_v17 }
 0x204   : > { %v1153_v22 = vpack.c.bf16 %v1129_v20, %v1127_v19  ;;  %v1075_v31 = vpop.f32.mrb[48].mxu0 }
 0x205   : > { %v1076_v32 = vadd.f32 %v1075_v31, %v3187_v9  ;;  %v1077_v23 = vpop.f32.mrb[49].mxu0 }
 0x206   : > { %v1078_v25 = vadd.f32 %v1077_v23, %v3190_v10  ;;  %v1079_v27 = vpop.f32.mrb[50].mxu0  ;;  %1428 = vmatprep.mubr.bf16.mxu1 %v1153_v22 }
 0x207   : > { %v1080_v30 = vadd.f32 %v1079_v27, %v3187_v9  ;;  %v1081_v35 = vpop.f32.mrb[51].mxu0  ;;  %1429 = vmatmul.mubr.bf16.gmra.mrb[28].mxu1 %v1152_v21  ;;  %v1130_v37 = vmax.f32 %v1076_v32, 0.0 }
 0x208   : > { %v1082_v36 = vadd.f32 %v1081_v35, %v3190_v10  ;;  %v1131_v43 = vmax.f32 %v1078_v25, 0.0 }
 0x209   : > { %v1132_v39 = vmax.f32 %v1080_v30, 0.0 }
 0x20a   : > { %v1133_v44 = vmax.f32 %v1082_v36, 0.0 }
 0x20b   : > { %v1154_v45 = vpack.c.bf16 %v1132_v39, %v1130_v37 }
 0x20c   : > { %v1155_v47 = vpack.c.bf16 %v1133_v44, %v1131_v43  ;;  %v1085_v51 = vpop.f32.mrb[52].mxu0 }
 0x20d   : > { %v1086_v52 = vadd.f32 %v1085_v51, %v3187_v9  ;;  %v1087_v53 = vpop.f32.mrb[53].mxu0  ;;  %v2655_v51 = vld [vmem:[#allocation2 + $0xf4] ss:$8 sps:$4 sm:$0xff]  }
 0x20e   : > { %v1088_v55 = vadd.f32 %v1087_v53, %v3190_v10  ;;  %v1089_v59 = vpop.f32.mrb[54].mxu0  ;;  %1438 = vmatprep.mubr.bf16.mxu1 %v1155_v47  ;;  %v2650_v47 = vld [vmem:[#allocation2 + $0xe0] ss:$8 sps:$4 sm:$0xff]  }
 0x20f   : > { %v1090_v60 = vadd.f32 %v1089_v59, %v3187_v9  ;;  %v1091_v61 = vpop.f32.mrb[55].mxu0  ;;  %1439 = vmatmul.mubr.bf16.gmra.mrb[32].mxu1 %v1154_v45  ;;  %v1134_v63 = vmax.f32 %v1086_v52, 0.0  ;;  %v2652_v45 = vld [vmem:[#allocation2 + $0xe4] ss:$8 sps:$4 sm:$0xff]   ;;  %v2653_v52 = vld [vmem:[#allocation2 + $0xf0] ss:$8 sps:$4 sm:$0xff]  }
 0x210   : > { %v1092_v62 = vadd.f32 %v1091_v61, %v3190_v10  ;;  %v1135_v1 = vmax.f32 %v1088_v55, 0.0  ;;  %1759 = vmatprep.subr.bf16.mxu0 %v2652_v45  ;;  %v2658_v53 = vld [vmem:[%s3426_s9 + $0x48] sm:$0xff]   ;;  %v2660_v59 = vld [vmem:[%s3426_s9 + $0x50] sm:$0xff]   ;;  %v2662_v61 = vld [vmem:[%s3426_s9 + $0x58] sm:$0xff]  }
 0x211   : > { %v1136_v0 = vmax.f32 %v1090_v60, 0.0  ;;  %1760 = vmatpush1.bf16.msra.mxu0 %v2650_v47  ;;  %v2659_v55 = vld [vmem:[%s3426_s9 + $0x8] sm:$0xff]   ;;  %v2661_v60 = vld [vmem:[%s3426_s9 + $0x10] sm:$0xff]  }
 0x212   : > { %v1137_v2 = vmax.f32 %v1092_v62, 0.0  ;;  %1761 = vmatprep.subr.bf16.mxu0 %v2655_v51  ;;  %v2663_v62 = vld [vmem:[%s3426_s9 + $0x18] sm:$0xff]  }
 0x213   : > { %v1156_v3 = vpack.c.bf16 %v1136_v0, %v1134_v63  ;;  %v2664_v63 = vld [vmem:[%s3426_s9 + $0x60] sm:$0xff]  }
 0x214   : > { %v1157_v4 = vpack.c.bf16 %v1137_v2, %v1135_v1  ;;  %v1095_v5 = vpop.f32.mrb[56].mxu0  ;;  %v2665_v0 = vld [vmem:[%s3426_s9 + $0x20] sm:$0xff]   ;;  %v2666_v1 = vld [vmem:[%s3426_s9 + $0x68] sm:$0xff]  }
 0x215   : > { %v1096_v6 = vadd.f32 %v1095_v5, %v3187_v9  ;;  %v1097_v7 = vpop.f32.mrb[57].mxu0  ;;  %1762 = vmatpush1.bf16.msra.mxu0 %v2653_v52  ;;  %v2667_v2 = vld [vmem:[%s3426_s9 + $0x28] sm:$0xff]   ;;  %v1194_v5 = vld [vmem:[%s3423_s6] sm:$0x3] }
 0x216   : > { %v1098_v8 = vadd.f32 %v1097_v7, %v3190_v10  ;;  %v1099_v11 = vpop.f32.mrb[58].mxu0  ;;  %1448 = vmatprep.mubr.bf16.mxu1 %v1157_v4  ;;  %v2669_v4 = vld [vmem:[%s3426_s9 + $0x30] sm:$0xff]   ;;  %v3273_v7 = vrot.slane %v1194_v5, %v3090_v28 }
 0x217   : > { %v1100_v12 = vadd.f32 %v1099_v11, %v3187_v9  ;;  %v1101_v13 = vpop.f32.mrb[59].mxu0  ;;  %1449 = vmatmul.mubr.bf16.gmra.mrb[36].mxu1 %v1156_v3  ;;  %v1138_v15 = vmax.f32 %v1096_v6, 0.0  ;;  %v2668_v3 = vld [vmem:[%s3426_s9 + $0x70] sm:$0xff]   ;;  %v3270_v6 = vrot.slane %v1194_v5, %v3085_v26 }
 0x218   : > { %v1102_v14 = vadd.f32 %v1101_v13, %v3190_v10  ;;  %v1139_v17 = vmax.f32 %v1098_v8, 0.0 }
 0x219   : > { %v1140_v16 = vmax.f32 %v1100_v12, 0.0 }
 0x21a   : > { %v1141_v18 = vmax.f32 %v1102_v14, 0.0 }
 0x21b   : > { %v1158_v19 = vpack.c.bf16 %v1140_v16, %v1138_v15 }
 0x21c   : > { %v1159_v20 = vpack.c.bf16 %v1141_v18, %v1139_v17  ;;  %v1105_v21 = vpop.f32.mrb[60].mxu0 }
 0x21d   : > { %v1106_v22 = vadd.f32 %v1105_v21, %v3187_v9  ;;  %v1107_v31 = vpop.f32.mrb[61].mxu0 }
 0x21e   : > { %v1108_v32 = vadd.f32 %v1107_v31, %v3190_v10  ;;  %v1109_v23 = vpop.f32.mrb[62].mxu0  ;;  %1458 = vmatprep.mubr.bf16.mxu1 %v1159_v20 }
 0x21f   : > { %v1110_v25 = vadd.f32 %v1109_v23, %v3187_v9  ;;  %v1111_v27 = vpop.f32.mrb[63].mxu0  ;;  %1459 = vmatmul.mubr.bf16.gmra.mrb[40].mxu1 %v1158_v19  ;;  %v1142_v35 = vmax.f32 %v1106_v22, 0.0  ;;  %v2656_v9 = vld [vmem:[%s3426_s9 + $0x40] sm:$0xff]  }
 0x220   : > { %v1112_v30 = vadd.f32 %v1111_v27, %v3190_v10  ;;  %v1143_v37 = vmax.f32 %v1108_v32, 0.0  ;;  %v2657_v10 = vld [vmem:[%s3426_s9] sm:$0xff]   ;;  %2398 = vmatprep.subr.bf16.mxu1 %v2656_v9 }
 0x221   : > { %v1144_v36 = vmax.f32 %v1110_v25, 0.0  ;;  %2399 = vmatpush3.bf16.msra.mxu1 %v2657_v10 }
 0x222   : > { %v1145_v39 = vmax.f32 %v1112_v30, 0.0  ;;  %2400 = vmatprep.subr.bf16.mxu1 %v2658_v53 }
 0x223   : > { %v1160_v43 = vpack.c.bf16 %v1144_v36, %v1142_v35 }
 0x224   : > { %v1161_v44 = vpack.c.bf16 %v1145_v39, %v1143_v37 }
 0x225   : > { %2401 = vmatpush3.bf16.msra.mxu1 %v2659_v55 }
 0x226   : > { %1468 = vmatprep.mubr.bf16.mxu1 %v1161_v44  ;;  %2402 = vmatprep.subr.bf16.mxu1 %v2660_v59 }
 0x227   : > { %1469 = vmatmul.mubr.bf16.gmra.mrb[44].mxu1 %v1160_v43 }
 0x229   : > { %2403 = vmatpush3.bf16.msra.mxu1 %v2661_v60 }
 0x22a   : > { %2404 = vmatprep.subr.bf16.mxu1 %v2662_v61 }
 0x22d   : > { %2405 = vmatpush3.bf16.msra.mxu1 %v2663_v62 }
 0x22e   : > { %2406 = vmatprep.subr.bf16.mxu1 %v2664_v63 }
 0x231   : > { %2407 = vmatpush3.bf16.msra.mxu1 %v2665_v0 }
 0x232   : > { %2408 = vmatprep.subr.bf16.mxu1 %v2666_v1 }
 0x235   : > { %2409 = vmatpush3.bf16.msra.mxu1 %v2667_v2 }
 0x236   : > { %2410 = vmatprep.subr.bf16.mxu1 %v2668_v3 }
 0x239   : > { %2411 = vmatpush3.bf16.msra.mxu1 %v2669_v4 }
 0x2c2   : > { %v1400_v8 = vpop.f32.mrb[16].mxu1 }
 0x2c3   : > { %v1401_v11 = vadd.f32 %v1400_v8, %v3270_v6  ;;  %v1402_v12 = vpop.f32.mrb[17].mxu1 }
 0x2c4   : > { %v1403_v13 = vadd.f32 %v1402_v12, %v3273_v7  ;;  %v1404_v14 = vpop.f32.mrb[18].mxu1 }
 0x2c5   : > { %v1405_v15 = vadd.f32 %v1404_v14, %v3270_v6  ;;  %v1406_v16 = vpop.f32.mrb[19].mxu1  ;;  %v1479_v18 = vmax.f32 %v1401_v11, 0.0 }
 0x2c6   : > { %v1407_v17 = vadd.f32 %v1406_v16, %v3273_v7  ;;  %v1480_v20 = vmax.f32 %v1403_v13, 0.0 }
 0x2c7   : > { %v1481_v19 = vmax.f32 %v1405_v15, 0.0 }
 0x2c8   : > { %v1482_v21 = vmax.f32 %v1407_v17, 0.0 }
 0x2c9   : > { %v1511_v22 = vpack.c.bf16 %v1481_v19, %v1479_v18 }
 0x2ca   : > { %v1512_v31 = vpack.c.bf16 %v1482_v21, %v1480_v20  ;;  %v1410_v32 = vpop.f32.mrb[20].mxu1 }
 0x2cb   : > { %v1411_v23 = vadd.f32 %v1410_v32, %v3270_v6  ;;  %v1412_v25 = vpop.f32.mrb[21].mxu1 }
 0x2cc   : > { %v1413_v27 = vadd.f32 %v1412_v25, %v3273_v7  ;;  %v1414_v30 = vpop.f32.mrb[22].mxu1  ;;  %1763 = vmatprep.mubr.bf16.mxu0 %v1512_v31 }
 0x2cd   : > { %v1415_v35 = vadd.f32 %v1414_v30, %v3270_v6  ;;  %v1416_v36 = vpop.f32.mrb[23].mxu1  ;;  %1764 = vmatmul.mubr.bf16.vlgmr.msra.gmra.mrb[64].mxu0 %v1511_v22  ;;  %v1483_v39 = vmax.f32 %v1411_v23, 0.0 }
 0x2ce   : > { %v1417_v37 = vadd.f32 %v1416_v36, %v3273_v7  ;;  %v1484_v44 = vmax.f32 %v1413_v27, 0.0 }
 0x2cf   : > { %v1485_v43 = vmax.f32 %v1415_v35, 0.0 }
 0x2d0   : > { %v1486_v45 = vmax.f32 %v1417_v37, 0.0 }
 0x2d1   : > { %v1513_v47 = vpack.c.bf16 %v1485_v43, %v1483_v39 }
 0x2d2   : > { %v1514_v51 = vpack.c.bf16 %v1486_v45, %v1484_v44  ;;  %v1420_v52 = vpop.f32.mrb[24].mxu1 }
 0x2d3   : > { %v1421_v9 = vadd.f32 %v1420_v52, %v3270_v6  ;;  %v1422_v10 = vpop.f32.mrb[25].mxu1 }
 0x2d4   : > { %v1423_v53 = vadd.f32 %v1422_v10, %v3273_v7  ;;  %v1424_v55 = vpop.f32.mrb[26].mxu1  ;;  %1773 = vmatprep.mubr.bf16.mxu0 %v1514_v51 }
 0x2d5   : > { %v1425_v59 = vadd.f32 %v1424_v55, %v3270_v6  ;;  %v1426_v60 = vpop.f32.mrb[27].mxu1  ;;  %1774 = vmatmul.mubr.bf16.gmra.mrb[68].mxu0 %v1513_v47  ;;  %v1487_v62 = vmax.f32 %v1421_v9, 0.0 }
 0x2d6   : > { %v1427_v61 = vadd.f32 %v1426_v60, %v3273_v7  ;;  %v1488_v0 = vmax.f32 %v1423_v53, 0.0 }
 0x2d7   : > { %v1489_v63 = vmax.f32 %v1425_v59, 0.0 }
 0x2d8   : > { %v1490_v1 = vmax.f32 %v1427_v61, 0.0 }
 0x2d9   : > { %v1515_v2 = vpack.c.bf16 %v1489_v63, %v1487_v62 }
 0x2da   : > { %v1516_v3 = vpack.c.bf16 %v1490_v1, %v1488_v0  ;;  %v1430_v4 = vpop.f32.mrb[28].mxu1 }
 0x2db   : > { %v1431_v5 = vadd.f32 %v1430_v4, %v3270_v6  ;;  %v1432_v8 = vpop.f32.mrb[29].mxu1 }
 0x2dc   : > { %v1433_v11 = vadd.f32 %v1432_v8, %v3273_v7  ;;  %v1434_v12 = vpop.f32.mrb[30].mxu1  ;;  %1783 = vmatprep.mubr.bf16.mxu0 %v1516_v3 }
 0x2dd   : > { %v1435_v13 = vadd.f32 %v1434_v12, %v3270_v6  ;;  %v1436_v14 = vpop.f32.mrb[31].mxu1  ;;  %1784 = vmatmul.mubr.bf16.gmra.mrb[72].mxu0 %v1515_v2  ;;  %v1491_v16 = vmax.f32 %v1431_v5, 0.0 }
 0x2de   : > { %v1437_v15 = vadd.f32 %v1436_v14, %v3273_v7  ;;  %v1492_v18 = vmax.f32 %v1433_v11, 0.0 }
 0x2df   : > { %v1493_v17 = vmax.f32 %v1435_v13, 0.0 }
 0x2e0   : > { %v1494_v19 = vmax.f32 %v1437_v15, 0.0 }
 0x2e1   : > { %v1517_v20 = vpack.c.bf16 %v1493_v17, %v1491_v16 }
 0x2e2   : > { %v1518_v21 = vpack.c.bf16 %v1494_v19, %v1492_v18  ;;  %v1440_v22 = vpop.f32.mrb[32].mxu1 }
 0x2e3   : > { %v1441_v31 = vadd.f32 %v1440_v22, %v3270_v6  ;;  %v1442_v32 = vpop.f32.mrb[33].mxu1 }
 0x2e4   : > { %v1443_v23 = vadd.f32 %v1442_v32, %v3273_v7  ;;  %v1444_v25 = vpop.f32.mrb[34].mxu1  ;;  %1793 = vmatprep.mubr.bf16.mxu0 %v1518_v21 }
 0x2e5   : > { %v1445_v27 = vadd.f32 %v1444_v25, %v3270_v6  ;;  %v1446_v30 = vpop.f32.mrb[35].mxu1  ;;  %1794 = vmatmul.mubr.bf16.gmra.mrb[76].mxu0 %v1517_v20  ;;  %v1495_v36 = vmax.f32 %v1441_v31, 0.0 }
 0x2e6   : > { %v1447_v35 = vadd.f32 %v1446_v30, %v3273_v7  ;;  %v1496_v39 = vmax.f32 %v1443_v23, 0.0 }
 0x2e7   : > { %v1497_v37 = vmax.f32 %v1445_v27, 0.0 }
 0x2e8   : > { %v1498_v43 = vmax.f32 %v1447_v35, 0.0 }
 0x2e9   : > { %v1519_v44 = vpack.c.bf16 %v1497_v37, %v1495_v36 }
 0x2ea   : > { %v1520_v45 = vpack.c.bf16 %v1498_v43, %v1496_v39  ;;  %v1450_v47 = vpop.f32.mrb[36].mxu1 }
 0x2eb   : > { %v1451_v51 = vadd.f32 %v1450_v47, %v3270_v6  ;;  %v1452_v52 = vpop.f32.mrb[37].mxu1 }
 0x2ec   : > { %v1453_v9 = vadd.f32 %v1452_v52, %v3273_v7  ;;  %v1454_v10 = vpop.f32.mrb[38].mxu1  ;;  %1803 = vmatprep.mubr.bf16.mxu0 %v1520_v45 }
 0x2ed   : > { %v1455_v53 = vadd.f32 %v1454_v10, %v3270_v6  ;;  %v1456_v55 = vpop.f32.mrb[39].mxu1  ;;  %1804 = vmatmul.mubr.bf16.gmra.mrb[80].mxu0 %v1519_v44  ;;  %v1499_v60 = vmax.f32 %v1451_v51, 0.0  ;;  %v2670_v44 = vld [vmem:[%s3426_s9 + $0x78] sm:$0xff]  }
 0x2ee   : > { %v1457_v59 = vadd.f32 %v1456_v55, %v3273_v7  ;;  %v1500_v62 = vmax.f32 %v1453_v9, 0.0  ;;  %2412 = vmatprep.subr.bf16.mxu1 %v2670_v44 }
 0x2ef   : > { %v1501_v61 = vmax.f32 %v1455_v53, 0.0 }
 0x2f0   : > { %v1502_v63 = vmax.f32 %v1457_v59, 0.0 }
 0x2f1   : > { %v1521_v0 = vpack.c.bf16 %v1501_v61, %v1499_v60 }
 0x2f2   : > { %v1522_v1 = vpack.c.bf16 %v1502_v63, %v1500_v62  ;;  %v1460_v2 = vpop.f32.mrb[40].mxu1 }
 0x2f3   : > { %v1461_v3 = vadd.f32 %v1460_v2, %v3270_v6  ;;  %v1462_v4 = vpop.f32.mrb[41].mxu1 }
 0x2f4   : > { %v1463_v5 = vadd.f32 %v1462_v4, %v3273_v7  ;;  %v1464_v8 = vpop.f32.mrb[42].mxu1  ;;  %1813 = vmatprep.mubr.bf16.mxu0 %v1522_v1 }
 0x2f5   : > { %v1465_v11 = vadd.f32 %v1464_v8, %v3270_v6  ;;  %v1466_v12 = vpop.f32.mrb[43].mxu1  ;;  %1814 = vmatmul.mubr.bf16.gmra.mrb[84].mxu0 %v1521_v0  ;;  %v1503_v14 = vmax.f32 %v1461_v3, 0.0 }
 0x2f6   : > { %v1467_v13 = vadd.f32 %v1466_v12, %v3273_v7  ;;  %v1504_v16 = vmax.f32 %v1463_v5, 0.0 }
 0x2f7   : > { %v1505_v15 = vmax.f32 %v1465_v11, 0.0 }
 0x2f8   : > { %v1506_v17 = vmax.f32 %v1467_v13, 0.0 }
 0x2f9   : > { %v1523_v18 = vpack.c.bf16 %v1505_v15, %v1503_v14 }
 0x2fa   : > { %v1524_v19 = vpack.c.bf16 %v1506_v17, %v1504_v16  ;;  %v1470_v20 = vpop.f32.mrb[44].mxu1 }
 0x2fb   : > { %v1471_v21 = vadd.f32 %v1470_v20, %v3270_v6  ;;  %v1472_v22 = vpop.f32.mrb[45].mxu1 }
 0x2fc   : > { %v1473_v31 = vadd.f32 %v1472_v22, %v3273_v7  ;;  %v1474_v32 = vpop.f32.mrb[46].mxu1  ;;  %1823 = vmatprep.mubr.bf16.mxu0 %v1524_v19 }
 0x2fd   : > { %v1475_v23 = vadd.f32 %v1474_v32, %v3270_v6  ;;  %v1476_v25 = vpop.f32.mrb[47].mxu1  ;;  %1824 = vmatmul.mubr.bf16.gmra.mrb[88].mxu0 %v1523_v18  ;;  %v1507_v30 = vmax.f32 %v1471_v21, 0.0  ;;  %v2671_v6 = vld [vmem:[%s3426_s9 + $0x38] sm:$0xff]  }
 0x2fe   : > { %v1477_v27 = vadd.f32 %v1476_v25, %v3273_v7  ;;  %v1508_v36 = vmax.f32 %v1473_v31, 0.0  ;;  %2413 = vmatpush3.bf16.msra.mxu1 %v2671_v6  ;;  %v1559_v7 = vld [vmem:[%s3425_s8] sm:$0x3] }
 0x2ff   : > { %v1509_v35 = vmax.f32 %v1475_v23, 0.0  ;;  %v3317_v45 = vrot.slane %v1559_v7, %v3085_v26  ;;  %v3320_v47 = vrot.slane %v1559_v7, %v3090_v28 }
 0x300   : > { %v1510_v37 = vmax.f32 %v1477_v27, 0.0 }
 0x301   : > { %v1525_v39 = vpack.c.bf16 %v1509_v35, %v1507_v30 }
 0x302   : > { %v1526_v43 = vpack.c.bf16 %v1510_v37, %v1508_v36 }
 0x304   : > { %1833 = vmatprep.mubr.bf16.mxu0 %v1526_v43 }
 0x305   : > { %1834 = vmatmul.mubr.bf16.gmra.mrb[92].mxu0 %v1525_v39 }
 0x3a0   : > { %v1765_v51 = vpop.f32.mrb[64].mxu0 }
 0x3a1   : > { %v1766_v52 = vadd.f32 %v1765_v51, %v3317_v45  ;;  %v1767_v9 = vpop.f32.mrb[65].mxu0 }
 0x3a2   : > { %v1768_v10 = vadd.f32 %v1767_v9, %v3320_v47  ;;  %v1769_v53 = vpop.f32.mrb[66].mxu0 }
 0x3a3   : > { %v1770_v55 = vadd.f32 %v1769_v53, %v3317_v45  ;;  %v1771_v59 = vpop.f32.mrb[67].mxu0  ;;  %v1844_v61 = vmax.f32 %v1766_v52, 0.0 }
 0x3a4   : > { %v1772_v60 = vadd.f32 %v1771_v59, %v3320_v47  ;;  %v1845_v63 = vmax.f32 %v1768_v10, 0.0 }
 0x3a5   : > { %v1846_v62 = vmax.f32 %v1770_v55, 0.0 }
 0x3a6   : > { %v1847_v26 = vmax.f32 %v1772_v60, 0.0 }
 0x3a7   : > { %v1876_v0 = vpack.c.bf16 %v1846_v62, %v1844_v61 }
 0x3a8   : > { %v1877_v1 = vpack.c.bf16 %v1847_v26, %v1845_v63  ;;  %v1775_v28 = vpop.f32.mrb[68].mxu0 }
 0x3a9   : > { %v1776_v2 = vadd.f32 %v1775_v28, %v3317_v45  ;;  %v1777_v3 = vpop.f32.mrb[69].mxu0 }
 0x3aa   : > { %v1778_v4 = vadd.f32 %v1777_v3, %v3320_v47  ;;  %v1779_v5 = vpop.f32.mrb[70].mxu0  ;;  %2052 = vmatprep.mubr.bf16.mxu1 %v1877_v1 }
 0x3ab   : > { %v1780_v8 = vadd.f32 %v1779_v5, %v3317_v45  ;;  %v1781_v11 = vpop.f32.mrb[71].mxu0  ;;  %2053 = vmatmul.mubr.bf16.vlgmr.msra.gmra.mrb[48].mxu1 %v1876_v0  ;;  %v1848_v13 = vmax.f32 %v1776_v2, 0.0 }
 0x3ac   : > { %v1782_v12 = vadd.f32 %v1781_v11, %v3320_v47  ;;  %v1849_v15 = vmax.f32 %v1778_v4, 0.0 }
 0x3ad   : > { %v1850_v14 = vmax.f32 %v1780_v8, 0.0 }
 0x3ae   : > { %v1851_v16 = vmax.f32 %v1782_v12, 0.0 }
 0x3af   : > { %v1878_v17 = vpack.c.bf16 %v1850_v14, %v1848_v13 }
 0x3b0   : > { %v1879_v18 = vpack.c.bf16 %v1851_v16, %v1849_v15  ;;  %v1785_v19 = vpop.f32.mrb[72].mxu0 }
 0x3b1   : > { %v1786_v20 = vadd.f32 %v1785_v19, %v3317_v45  ;;  %v1787_v21 = vpop.f32.mrb[73].mxu0 }
 0x3b2   : > { %v1788_v22 = vadd.f32 %v1787_v21, %v3320_v47  ;;  %v1789_v31 = vpop.f32.mrb[74].mxu0  ;;  %2060 = vmatprep.mubr.bf16.mxu1 %v1879_v18 }
 0x3b3   : > { %v1790_v32 = vadd.f32 %v1789_v31, %v3317_v45  ;;  %v1791_v23 = vpop.f32.mrb[75].mxu0  ;;  %2061 = vmatmul.mubr.bf16.gmra.mrb[52].mxu1 %v1878_v17  ;;  %v1852_v27 = vmax.f32 %v1786_v20, 0.0 }
 0x3b4   : > { %v1792_v25 = vadd.f32 %v1791_v23, %v3320_v47  ;;  %v1853_v35 = vmax.f32 %v1788_v22, 0.0 }
 0x3b5   : > { %v1854_v30 = vmax.f32 %v1790_v32, 0.0 }
 0x3b6   : > { %v1855_v36 = vmax.f32 %v1792_v25, 0.0 }
 0x3b7   : > { %v1880_v37 = vpack.c.bf16 %v1854_v30, %v1852_v27 }
 0x3b8   : > { %v1881_v39 = vpack.c.bf16 %v1855_v36, %v1853_v35  ;;  %v1795_v43 = vpop.f32.mrb[76].mxu0 }
 0x3b9   : > { %v1796_v44 = vadd.f32 %v1795_v43, %v3317_v45  ;;  %v1797_v6 = vpop.f32.mrb[77].mxu0 }
 0x3ba   : > { %v1798_v7 = vadd.f32 %v1797_v6, %v3320_v47  ;;  %v1799_v51 = vpop.f32.mrb[78].mxu0  ;;  %2068 = vmatprep.mubr.bf16.mxu1 %v1881_v39 }
 0x3bb   : > { %v1800_v52 = vadd.f32 %v1799_v51, %v3317_v45  ;;  %v1801_v9 = vpop.f32.mrb[79].mxu0  ;;  %2069 = vmatmul.mubr.bf16.gmra.mrb[56].mxu1 %v1880_v37  ;;  %v1856_v53 = vmax.f32 %v1796_v44, 0.0 }
 0x3bc   : > { %v1802_v10 = vadd.f32 %v1801_v9, %v3320_v47  ;;  %v1857_v59 = vmax.f32 %v1798_v7, 0.0 }
 0x3bd   : > { %v1858_v55 = vmax.f32 %v1800_v52, 0.0 }
 0x3be   : > { %v1859_v60 = vmax.f32 %v1802_v10, 0.0 }
 0x3bf   : > { %v1882_v61 = vpack.c.bf16 %v1858_v55, %v1856_v53 }
 0x3c0   : > { %v1883_v62 = vpack.c.bf16 %v1859_v60, %v1857_v59  ;;  %v1805_v63 = vpop.f32.mrb[80].mxu0 }
 0x3c1   : > { %v1806_v26 = vadd.f32 %v1805_v63, %v3317_v45  ;;  %v1807_v0 = vpop.f32.mrb[81].mxu0 }
 0x3c2   : > { %v1808_v1 = vadd.f32 %v1807_v0, %v3320_v47  ;;  %v1809_v28 = vpop.f32.mrb[82].mxu0  ;;  %2076 = vmatprep.mubr.bf16.mxu1 %v1883_v62 }
 0x3c3   : > { %v1810_v2 = vadd.f32 %v1809_v28, %v3317_v45  ;;  %v1811_v3 = vpop.f32.mrb[83].mxu0  ;;  %2077 = vmatmul.mubr.bf16.gmra.mrb[60].mxu1 %v1882_v61  ;;  %v1860_v5 = vmax.f32 %v1806_v26, 0.0 }
 0x3c4   : > { %v1812_v4 = vadd.f32 %v1811_v3, %v3320_v47  ;;  %v1861_v11 = vmax.f32 %v1808_v1, 0.0 }
 0x3c5   : > { %v1862_v8 = vmax.f32 %v1810_v2, 0.0 }
 0x3c6   : > { %v1863_v12 = vmax.f32 %v1812_v4, 0.0 }
 0x3c7   : > { %v1884_v13 = vpack.c.bf16 %v1862_v8, %v1860_v5 }
 0x3c8   : > { %v1885_v14 = vpack.c.bf16 %v1863_v12, %v1861_v11  ;;  %v1815_v15 = vpop.f32.mrb[84].mxu0 }
 0x3c9   : > { %v1816_v16 = vadd.f32 %v1815_v15, %v3317_v45  ;;  %v1817_v17 = vpop.f32.mrb[85].mxu0 }
 0x3ca   : > { %v1818_v18 = vadd.f32 %v1817_v17, %v3320_v47  ;;  %v1819_v19 = vpop.f32.mrb[86].mxu0  ;;  %2084 = vmatprep.mubr.bf16.mxu1 %v1885_v14 }
 0x3cb   : > { %v1820_v20 = vadd.f32 %v1819_v19, %v3317_v45  ;;  %v1821_v21 = vpop.f32.mrb[87].mxu0  ;;  %2085 = vmatmul.mubr.bf16.gmra.mrb[64].mxu1 %v1884_v13  ;;  %v1864_v31 = vmax.f32 %v1816_v16, 0.0 }
 0x3cc   : > { %v1822_v22 = vadd.f32 %v1821_v21, %v3320_v47  ;;  %v1865_v23 = vmax.f32 %v1818_v18, 0.0 }
 0x3cd   : > { %v1866_v32 = vmax.f32 %v1820_v20, 0.0 }
 0x3ce   : > { %v1867_v25 = vmax.f32 %v1822_v22, 0.0 }
 0x3cf   : > { %v1886_v27 = vpack.c.bf16 %v1866_v32, %v1864_v31 }
 0x3d0   : > { %v1887_v30 = vpack.c.bf16 %v1867_v25, %v1865_v23  ;;  %v1825_v35 = vpop.f32.mrb[88].mxu0 }
 0x3d1   : > { %v1826_v36 = vadd.f32 %v1825_v35, %v3317_v45  ;;  %v1827_v37 = vpop.f32.mrb[89].mxu0 }
 0x3d2   : > { %v1828_v39 = vadd.f32 %v1827_v37, %v3320_v47  ;;  %v1829_v43 = vpop.f32.mrb[90].mxu0  ;;  %2092 = vmatprep.mubr.bf16.mxu1 %v1887_v30 }
 0x3d3   : > { %v1830_v44 = vadd.f32 %v1829_v43, %v3317_v45  ;;  %v1831_v6 = vpop.f32.mrb[91].mxu0  ;;  %2093 = vmatmul.mubr.bf16.gmra.mrb[68].mxu1 %v1886_v27  ;;  %v1868_v51 = vmax.f32 %v1826_v36, 0.0 }
 0x3d4   : > { %v1832_v7 = vadd.f32 %v1831_v6, %v3320_v47  ;;  %v1869_v9 = vmax.f32 %v1828_v39, 0.0 }
 0x3d5   : > { %v1870_v52 = vmax.f32 %v1830_v44, 0.0 }
 0x3d6   : > { %v1871_v10 = vmax.f32 %v1832_v7, 0.0 }
 0x3d7   : > { %v1888_v53 = vpack.c.bf16 %v1870_v52, %v1868_v51 }
 0x3d8   : > { %v1889_v55 = vpack.c.bf16 %v1871_v10, %v1869_v9  ;;  %v1835_v59 = vpop.f32.mrb[92].mxu0 }
 0x3d9   : > { %v1836_v60 = vadd.f32 %v1835_v59, %v3317_v45  ;;  %v1837_v61 = vpop.f32.mrb[93].mxu0 }
 0x3da   : > { %v1838_v62 = vadd.f32 %v1837_v61, %v3320_v47  ;;  %v1839_v63 = vpop.f32.mrb[94].mxu0  ;;  %2100 = vmatprep.mubr.bf16.mxu1 %v1889_v55 }
 0x3db   : > { %v1840_v26 = vadd.f32 %v1839_v63, %v3317_v45  ;;  %v1841_v0 = vpop.f32.mrb[95].mxu0  ;;  %2101 = vmatmul.mubr.bf16.gmra.mrb[72].mxu1 %v1888_v53  ;;  %v1872_v28 = vmax.f32 %v1836_v60, 0.0  ;;  %v3357_v45 = vld [vmem:[%s3427_s10] ss:$0 sm:$0xff] }
 0x3dc   : > { %v1842_v1 = vadd.f32 %v1841_v0, %v3320_v47  ;;  %v1873_v3 = vmax.f32 %v1838_v62, 0.0 }
 0x3dd   : > { %v1874_v2 = vmax.f32 %v1840_v26, 0.0 }
 0x3de   : > { %v1875_v4 = vmax.f32 %v1842_v1, 0.0 }
 0x3df   : > { %v1890_v5 = vpack.c.bf16 %v1874_v2, %v1872_v28 }
 0x3e0   : > { %v1891_v8 = vpack.c.bf16 %v1875_v4, %v1873_v3 }
 0x3e2   : > { %2108 = vmatprep.mubr.bf16.mxu1 %v1891_v8 }
 0x3e3   : > { %2109 = vmatmul.mubr.bf16.gmra.mrb[76].mxu1 %v1890_v5 }
 0x47e   : > { %v2414_v11 = vpop.f32.mrb[48].mxu1 }
 0x47f   : > { %v2415_v12 = vpop.f32.mrb[49].mxu1 }
 0x480   : > { %v2416_v13 = vadd.f32 %v2415_v12, %v2414_v11  ;;  %v2417_v14 = vpop.f32.mrb[50].mxu1 }
 0x481   : > { %v2418_v15 = vpop.f32.mrb[51].mxu1 }
 0x482   : > { %v2117_v47 = vadd.f32 %v2416_v13, %v3153_v29  ;;  %v2419_v16 = vadd.f32 %v2418_v15, %v2417_v14 }
 0x484   : > { %v2140_v17 = vadd.f32 %v3357_v45, %v2117_v47  ;;  %v2118_v18 = vadd.f32 %v2419_v16, %v3157_v34 }
 0x486   : > { %2156 = vst [vmem:[%s3365_s15] sm:$0xff] %v2140_v17  ;;  %v2141_v19 = vadd.f32 %v3357_v45, %v2118_v18  ;;  %v2420_v20 = vpop.f32.mrb[52].mxu1 }
 0x487   : > { %v2421_v29 = vpop.f32.mrb[53].mxu1 }
 0x488   : > { %2157 = vst [vmem:[%s3365_s15 + $0x8] sm:$0xff] %v2141_v19  ;;  %v2422_v21 = vadd.f32 %v2421_v29, %v2420_v20  ;;  %v2423_v22 = vpop.f32.mrb[54].mxu1 }
 0x489   : > { %v2424_v31 = vpop.f32.mrb[55].mxu1 }
 0x48a   : > { %v2119_v32 = vadd.f32 %v3151_v24, %v2422_v21  ;;  %v2425_v23 = vadd.f32 %v2424_v31, %v2423_v22 }
 0x48c   : > { %v2142_v25 = vadd.f32 %v3357_v45, %v2119_v32  ;;  %v2120_v27 = vadd.f32 %v3155_v33, %v2425_v23 }
 0x48e   : > { %2158 = vst [vmem:[%s3365_s15 + $0x10] sm:$0xff] %v2142_v25  ;;  %v2143_v34 = vadd.f32 %v3357_v45, %v2120_v27  ;;  %v2426_v30 = vpop.f32.mrb[56].mxu1 }
 0x48f   : > { %v2427_v35 = vpop.f32.mrb[57].mxu1 }
 0x490   : > { %2159 = vst [vmem:[%s3365_s15 + $0x18] sm:$0xff] %v2143_v34  ;;  %v2428_v36 = vadd.f32 %v2427_v35, %v2426_v30  ;;  %v2429_v37 = vpop.f32.mrb[58].mxu1 }
 0x491   : > { %v2430_v39 = vpop.f32.mrb[59].mxu1 }
 0x492   : > { %v2121_v43 = vadd.f32 %v2428_v36, %v3161_v40  ;;  %v2431_v24 = vadd.f32 %v2430_v39, %v2429_v37 }
 0x494   : > { %v2144_v44 = vadd.f32 %v3357_v45, %v2121_v43  ;;  %v2122_v6 = vadd.f32 %v2431_v24, %v3165_v42 }
 0x496   : > { %2160 = vst [vmem:[%s3365_s15 + $0x20] sm:$0xff] %v2144_v44  ;;  %v2145_v33 = vadd.f32 %v3357_v45, %v2122_v6  ;;  %v2432_v7 = vpop.f32.mrb[60].mxu1 }
 0x497   : > { %v2433_v51 = vpop.f32.mrb[61].mxu1 }
 0x498   : > { %2161 = vst [vmem:[%s3365_s15 + $0x28] sm:$0xff] %v2145_v33  ;;  %v2434_v52 = vadd.f32 %v2433_v51, %v2432_v7  ;;  %v2435_v9 = vpop.f32.mrb[62].mxu1 }
 0x499   : > { %v2436_v10 = vpop.f32.mrb[63].mxu1 }
 0x49a   : > { %v2123_v53 = vadd.f32 %v3159_v38, %v2434_v52  ;;  %v2437_v40 = vadd.f32 %v2436_v10, %v2435_v9 }
 0x49c   : > { %v2146_v55 = vadd.f32 %v3357_v45, %v2123_v53  ;;  %v2124_v59 = vadd.f32 %v3163_v41, %v2437_v40 }
 0x49e   : > { %2162 = vst [vmem:[%s3365_s15 + $0x30] sm:$0xff] %v2146_v55  ;;  %v2147_v42 = vadd.f32 %v3357_v45, %v2124_v59  ;;  %v2438_v60 = vpop.f32.mrb[64].mxu1 }
 0x49f   : > { %v2439_v61 = vpop.f32.mrb[65].mxu1 }
 0x4a0   : > { %2163 = vst [vmem:[%s3365_s15 + $0x38] sm:$0xff] %v2147_v42  ;;  %v2440_v62 = vadd.f32 %v2439_v61, %v2438_v60  ;;  %v2441_v63 = vpop.f32.mrb[66].mxu1 }
 0x4a1   : > { %v2442_v26 = vpop.f32.mrb[67].mxu1 }
 0x4a2   : > { %v2125_v0 = vadd.f32 %v2440_v62, %v3169_v48  ;;  %v2443_v38 = vadd.f32 %v2442_v26, %v2441_v63 }
 0x4a4   : > { %v2148_v1 = vadd.f32 %v3357_v45, %v2125_v0  ;;  %v2126_v28 = vadd.f32 %v2443_v38, %v3173_v50 }
 0x4a6   : > { %2164 = vst [vmem:[%s3365_s15 + $0x40] sm:$0xff] %v2148_v1  ;;  %v2149_v41 = vadd.f32 %v3357_v45, %v2126_v28  ;;  %v2444_v2 = vpop.f32.mrb[68].mxu1 }
 0x4a7   : > { %v2445_v3 = vpop.f32.mrb[69].mxu1 }
 0x4a8   : > { %2165 = vst [vmem:[%s3365_s15 + $0x48] sm:$0xff] %v2149_v41  ;;  %v2446_v4 = vadd.f32 %v2445_v3, %v2444_v2  ;;  %v2447_v5 = vpop.f32.mrb[70].mxu1 }
 0x4a9   : > { %v2448_v8 = vpop.f32.mrb[71].mxu1 }
 0x4aa   : > { %v2127_v11 = vadd.f32 %v3167_v46, %v2446_v4  ;;  %v2449_v48 = vadd.f32 %v2448_v8, %v2447_v5 }
 0x4ac   : > { %v2150_v12 = vadd.f32 %v3357_v45, %v2127_v11  ;;  %v2128_v13 = vadd.f32 %v3171_v49, %v2449_v48 }
 0x4ae   : > { %2166 = vst [vmem:[%s3365_s15 + $0x50] sm:$0xff] %v2150_v12  ;;  %v2151_v50 = vadd.f32 %v3357_v45, %v2128_v13  ;;  %v2450_v14 = vpop.f32.mrb[72].mxu1 }
 0x4af   : > { %v2451_v15 = vpop.f32.mrb[73].mxu1 }
 0x4b0   : > { %2167 = vst [vmem:[%s3365_s15 + $0x58] sm:$0xff] %v2151_v50  ;;  %v2452_v47 = vadd.f32 %v2451_v15, %v2450_v14  ;;  %v2453_v16 = vpop.f32.mrb[74].mxu1 }
 0x4b1   : > { %v2454_v17 = vpop.f32.mrb[75].mxu1 }
 0x4b2   : > { %v2129_v18 = vadd.f32 %v2452_v47, %v3177_v56  ;;  %v2455_v46 = vadd.f32 %v2454_v17, %v2453_v16 }
 0x4b4   : > { %v2152_v19 = vadd.f32 %v3357_v45, %v2129_v18  ;;  %v2130_v20 = vadd.f32 %v2455_v46, %v3181_v58 }
 0x4b6   : > { %2168 = vst [vmem:[%s3365_s15 + $0x60] sm:$0xff] %v2152_v19  ;;  %v2153_v49 = vadd.f32 %v3357_v45, %v2130_v20  ;;  %v2456_v29 = vpop.f32.mrb[76].mxu1 }
 0x4b7   : > { %v2457_v21 = vpop.f32.mrb[77].mxu1 }
 0x4b8   : > { %2169 = vst [vmem:[%s3365_s15 + $0x68] sm:$0xff] %v2153_v49  ;;  %v2458_v22 = vadd.f32 %v2457_v21, %v2456_v29  ;;  %v2459_v31 = vpop.f32.mrb[78].mxu1 }
 0x4b9   : > { %v2460_v32 = vpop.f32.mrb[79].mxu1 }
 0x4ba   : > { %v2131_v23 = vadd.f32 %v3175_v54, %v2458_v22  ;;  %v2461_v25 = vadd.f32 %v2460_v32, %v2459_v31 }
 0x4bc   : > { %v2154_v56 = vadd.f32 %v3357_v45, %v2131_v23  ;;  %v2132_v27 = vadd.f32 %v3179_v57, %v2461_v25 }
 0x4be   : > { %2170 = vst [vmem:[%s3365_s15 + $0x70] sm:$0xff] %v2154_v56  ;;  %v2155_v34 = vadd.f32 %v3357_v45, %v2132_v27 }
 0x4c0   : > { %2171 = vst [vmem:[%s3365_s15 + $0x78] sm:$0xff] %v2155_v34 }
 0x4c1 PF: > { %s22_s17 = sadd.s32 1, %s2710_s17  }
 0x4c2   : > { %p19_p3 = scmp.ge.s32.totalorder %s22_s17, 4  }
 0x4c4   :  { %21 = sbr.rel (!%p19_p3) target bundleno = 1 (0x1), region = 99 }
 0x4cb   :  { %2194 = vsyncpa [#allocation3], 1 }
 0x4cc   :  { %2196 = vsyncpa [#allocation3 + $0x1], 1 }

</bundles_post_ra>
